<compile_context>
chip_gen: v7x
topology: tpu7x:2x2x1
jax: 0.10.0
libtpu: 0.0.40
codegen_flags: <defaults>
</compile_context>

<pallas_src>
import numpy as np

import jax
import jax.numpy as jnp
from jax import lax
from jax.experimental import pallas as pl
from jax.experimental.pallas import tpu as pltpu

EPS = 1e-5


def maskconv_kernel(xp_ref, ra_ref, rb_ref, b1_ref, b2_ref, o_ref, h1pad_ref):
    # xp_ref:    (Nb, Hp, Wp*Cin)            f32  spatially padded, row-flattened x
    # ra_ref:    (3, Wp*Cin, W*Cout+Wp*Cmid) bf16 unrolled shortcut|conv1 weights
    # rb_ref:    (3, Wp*Cmid, W*Cout)        bf16 unrolled conv2 weights
    # b1_ref:    (1, Wp*Cmid) f32 BN1 bias (zero on W-padding column blocks)
    # b2_ref:    (1, W*Cout)  f32 BN2 bias + shortcut BN bias (folded), tiled over W
    # o_ref:     (Nb, H, W*Cout)             f32  lane-dense output
    # h1pad_ref: (Nb, Hp, Wp*Cmid)           f32  scratch: W-padded h1 (+ 2 zero rows)
    Nb, Hp, _ = xp_ref.shape
    H = Hp - 2
    WpCmid = h1pad_ref.shape[2]
    WCout = o_ref.shape[2]
    M = Nb * H

    # --- conv1 + shortcut: 3 row-shifted matmuls, f32 accumulation ----------
    acc = None
    for dy in range(3):
        lhs = xp_ref[:, dy:dy + H, :].reshape(M, -1).astype(jnp.bfloat16)
        part = jnp.dot(lhs, ra_ref[dy], preferred_element_type=jnp.float32)
        acc = part if acc is None else acc + part

    identity = acc[:, :WCout]                                  # shortcut (bias folded into b2)
    h1 = jnp.maximum(acc[:, WCout:] + b1_ref[...], 0.0)        # BN1 bias + ReLU; borders stay 0

    # --- stash h1 (already W-padded by zero weight columns); zero H-halo rows
    zrow = jnp.zeros((Nb, 1, WpCmid), h1pad_ref.dtype)
    h1pad_ref[:, 0:1, :] = zrow
    h1pad_ref[:, Hp - 1:Hp, :] = zrow
    h1pad_ref[:, 1:1 + H, :] = h1.reshape(Nb, H, WpCmid)

    # --- conv2: 3 row-shifted matmuls on the padded h1 ----------------------
    acc2 = None
    for dy in range(3):
        lhs2 = h1pad_ref[:, dy:dy + H, :].reshape(M, -1).astype(jnp.bfloat16)
        part = jnp.dot(lhs2, rb_ref[dy], preferred_element_type=jnp.float32)
        acc2 = part if acc2 is None else acc2 + part

    # residual add (+ folded biases) + ReLU; fully lane-dense store.
    out = jnp.maximum(identity + acc2 + b2_ref[...], 0.0)
    o_ref[...] = out.reshape(Nb, H, WCout).astype(o_ref.dtype)


def _fold_bn(gamma, beta, mean, var, eps=EPS):
    scale = gamma / jnp.sqrt(var + eps)
    bias = beta - mean * scale
    return scale, bias


def _unrolled_weight(w_oihw, scale, in_width, out_width, out_pad):
    """Spatially unroll a 3x3 conv weight into per-dy matmul matrices.

    Returns (3, in_width*I, total_out*O), total_out = out_width + 2*out_pad.
      row index = wx*I + i : column block wx of the padded (row, in_width*I) input
      col index = j*O + o  : column block j of the output row; block j holds output
                             spatial position j - out_pad (blocks outside
                             [0, out_width) are zero -> they emit W-padding).
    Per-output-channel BN scale is folded in.
    """
    O, I, KH, KW = w_oihw.shape
    w = jnp.transpose(w_oihw, (2, 3, 1, 0)) * scale[None, None, None, :]  # (KH,KW,I,O)
    total_out = out_width + 2 * out_pad
    sel = np.zeros((KW, in_width, total_out), np.float32)
    for dx in range(KW):
        for j in range(total_out):
            wpos = j - out_pad
            wx = wpos + dx                 # padded-input column feeding output col j
            if 0 <= wpos < out_width and 0 <= wx < in_width:
                sel[dx, wx, j] = 1.0
    m = jnp.einsum('dxj,ydio->yxijo', jnp.asarray(sel), w)
    return m.reshape(KH, in_width * I, total_out * O)


@jax.jit
def mask_conv_forward(x_nchw, w1, bn1, w2, bn2, wsc, bnsc):
    """Inference-mode MaskConv / DoubleConv forward.

    x_nchw: (N, Cin, H, W) f32
    w1: (Cmid, Cin, 3, 3), w2: (Cout, Cmid, 3, 3), wsc: (Cout, Cin, 3, 3)
    bn*: (gamma, beta, running_mean, running_var)
    returns (N, Cout, H, W) f32
    """
    N, Cin, H, W = x_nchw.shape
    Cmid = w1.shape[0]
    Cout = w2.shape[0]
    Hp, Wp = H + 2, W + 2

    s1, b1 = _fold_bn(*bn1)
    s2, b2 = _fold_bn(*bn2)
    ssc, bsc = _fold_bn(*bnsc)

    # Unrolled, BN-scaled weight matrices (shortcut first -> 128-aligned slices).
    ra_sc = _unrolled_weight(wsc, ssc, Wp, W, out_pad=0)       # (3, Wp*Cin, W*Cout)
    ra_1 = _unrolled_weight(w1, s1, Wp, W, out_pad=1)          # (3, Wp*Cin, Wp*Cmid)
    ra = jnp.concatenate([ra_sc, ra_1], axis=2).astype(jnp.bfloat16)
    rb = _unrolled_weight(w2, s2, Wp, W, out_pad=0).astype(jnp.bfloat16)  # (3, Wp*Cmid, W*Cout)

    # Biases laid out to match the lane-dense column blocks.
    b1t = jnp.concatenate(
        [jnp.zeros((1, Cmid), jnp.float32),
         jnp.tile(b1.reshape(1, Cmid), (1, W)),
         jnp.zeros((1, Cmid), jnp.float32)], axis=1).astype(jnp.float32)   # (1, Wp*Cmid)
    b2t = jnp.tile((b2 + bsc).reshape(1, Cout), (1, W)).astype(jnp.float32)  # (1, W*Cout)

    # NCHW -> NHWC, spatial zero-pad, flatten rows to lane-dense (N, Hp, Wp*Cin).
    x_nhwc = jnp.transpose(x_nchw, (0, 2, 3, 1)).astype(jnp.float32)
    xp = jnp.pad(x_nhwc, ((0, 0), (1, 1), (1, 1), (0, 0))).reshape(N, Hp, Wp * Cin)

    # Batch tile: big enough to amortize per-step overhead, capped at N//2 so the
    # parallel grid keeps >= 2 steps (both v7x TensorCores busy). Awkward batch
    # sizes are padded rather than degrading to Nb=1.
    target_rows = 2048
    cap = max(1, target_rows // (H * W))
    Nb = max(1, min(cap, N // 2)) if N >= 2 else 1
    n_blocks = -(-N // Nb)
    Npad = n_blocks * Nb
    if Npad != N:
        xp = jnp.pad(xp, ((0, Npad - N), (0, 0), (0, 0)))

    out_dense = pl.pallas_call(
        maskconv_kernel,
        out_shape=jax.ShapeDtypeStruct((Npad, H, W * Cout), jnp.float32),
        grid_spec=pltpu.PrefetchScalarGridSpec(
            num_scalar_prefetch=0,
            grid=(n_blocks,),
            in_specs=[
                pl.BlockSpec((Nb, Hp, Wp * Cin), lambda n: (n, 0, 0)),
                pl.BlockSpec((3, Wp * Cin, W * Cout + Wp * Cmid), lambda n: (0, 0, 0)),
                pl.BlockSpec((3, Wp * Cmid, W * Cout), lambda n: (0, 0, 0)),
                pl.BlockSpec((1, Wp * Cmid), lambda n: (0, 0)),
                pl.BlockSpec((1, W * Cout), lambda n: (0, 0)),
            ],
            out_specs=pl.BlockSpec((Nb, H, W * Cout), lambda n: (n, 0, 0)),
            scratch_shapes=[
                pltpu.VMEM((Nb, Hp, Wp * Cmid), jnp.float32),   # W-padded h1
            ],
        ),
        compiler_params=pltpu.CompilerParams(
            dimension_semantics=("parallel",)),
    )(xp, ra, rb, b1t, b2t)

    out_nhwc = out_dense[:N].reshape(N, H, W, Cout)
    return jnp.transpose(out_nhwc, (0, 3, 1, 2))  # back to NCHW


if __name__ == "__main__":
    # MaskConv(num_features_in=4, feature_size=32)
    N, Cin, H, W = 2, 4, 16, 16
    Cmid = Cout = 32

    key = jax.random.PRNGKey(0)
    k1, k2, k3, kx = jax.random.split(key, 4)

    # PyTorch Conv2d weight layout (O, I, 3, 3); deterministic synthetic init.
    w1 = jax.random.normal(k1, (Cmid, Cin, 3, 3), jnp.float32) * (1.0 / (Cin * 9) ** 0.5)
    w2 = jax.random.normal(k2, (Cout, Cmid, 3, 3), jnp.float32) * (1.0 / (Cmid * 9) ** 0.5)
    wsc = jax.random.normal(k3, (Cout, Cin, 3, 3), jnp.float32) * (1.0 / (Cin * 9) ** 0.5)

    # BatchNorm default eval-mode stats: gamma=1, beta=0, mean=0, var=1.
    def default_bn(C):
        return (jnp.ones((C,), jnp.float32), jnp.zeros((C,), jnp.float32),
                jnp.zeros((C,), jnp.float32), jnp.ones((C,), jnp.float32))

    bn1, bn2, bnsc = default_bn(Cmid), default_bn(Cout), default_bn(Cout)

    x = jax.random.normal(kx, (N, Cin, H, W), jnp.float32)

    out = mask_conv_forward(x, w1, bn1, w2, bn2, wsc, bnsc)
    out = jax.block_until_ready(out)
    assert out.shape == (N, Cout, H, W) and out.dtype == jnp.float32

    # Full-precision pure-JAX reference. The kernel feeds the MXU bf16
    # (single-pass, f32 accumulation), so the tolerance is loosened accordingly.
    def conv3x3_ref(x_nchw, w_oihw):
        return lax.conv_general_dilated(
            x_nchw, w_oihw, window_strides=(1, 1), padding=((1, 1), (1, 1)),
            dimension_numbers=("NCHW", "OIHW", "NCHW"),
            precision=lax.Precision.HIGHEST)

    def bn_apply(y, bn):
        s, b = _fold_bn(*bn)
        return y * s[None, :, None, None] + b[None, :, None, None]

    h1_ref = jnp.maximum(bn_apply(conv3x3_ref(x, w1), bn1), 0.0)
    ref = jnp.maximum(bn_apply(conv3x3_ref(h1_ref, w2), bn2)
                      + bn_apply(conv3x3_ref(x, wsc), bnsc), 0.0)

    max_err = float(jnp.max(jnp.abs(out - ref)))
    assert jnp.allclose(out, ref, atol=5e-2, rtol=5e-2), max_err

    print("KERNEL_OK")
</pallas_src>

<mosaic_0001>
module attributes {stable_mosaic.version = 11 : i64} {
  func.func @maskconv_kernel(%arg0: i32, %arg1: memref<1x18x72xf32, #tpu.memory_space<vmem>>, %arg2: memref<3x72x1088xbf16, #tpu.memory_space<vmem>>, %arg3: memref<3x576x512xbf16, #tpu.memory_space<vmem>>, %arg4: memref<1x576xf32, #tpu.memory_space<vmem>>, %arg5: memref<1x512xf32, #tpu.memory_space<vmem>>, %arg6: memref<1x16x512xf32, #tpu.memory_space<vmem>>, %arg7: memref<1x18x576xf32, #tpu.memory_space<vmem>>) attributes {dimension_semantics = [#tpu.dimension_semantics<parallel>], iteration_bounds = array<i64: 2>, scalar_prefetch = 0 : i64, scratch_operands = 1 : i64, tpu.core_type = #tpu.core_type<tc>, window_params = [{transform_indices = @transform_0, window_bounds = array<i64: 1, 18, 72>}, {pipeline_mode = #tpu.pipeline_mode<synchronous>, transform_indices = @transform_1, window_bounds = array<i64: 3, 72, 1088>}, {pipeline_mode = #tpu.pipeline_mode<synchronous>, transform_indices = @transform_2, window_bounds = array<i64: 3, 576, 512>}, {pipeline_mode = #tpu.pipeline_mode<synchronous>, transform_indices = @transform_3, window_bounds = array<i64: 1, 576>}, {pipeline_mode = #tpu.pipeline_mode<synchronous>, transform_indices = @transform_4, window_bounds = array<i64: 1, 512>}, {transform_indices = @transform_5, window_bounds = array<i64: 1, 16, 512>}]} {
    %c0 = arith.constant 0 : index
    %c0_0 = arith.constant 0 : index
    %c0_1 = arith.constant 0 : index
    %0 = vector.load %arg1[%c0, %c0_0, %c0_1] : memref<1x18x72xf32, #tpu.memory_space<vmem>>, vector<1x16x72xf32>
    %1 = vector.shape_cast %0 : vector<1x16x72xf32> to vector<16x72xf32>
    %2 = arith.truncf %1 : vector<16x72xf32> to vector<16x72xbf16>
    %c0_2 = arith.constant 0 : index
    %c0_3 = arith.constant 0 : index
    %c0_4 = arith.constant 0 : index
    %3 = vector.load %arg2[%c0_2, %c0_3, %c0_4] : memref<3x72x1088xbf16, #tpu.memory_space<vmem>>, vector<1x72x1088xbf16>
    %4 = vector.shape_cast %3 : vector<1x72x1088xbf16> to vector<72x1088xbf16>
    %cst = arith.constant dense<0.000000e+00> : vector<16x1088xf32>
    %5 = tpu.matmul %2, %4, %cst {dimension_numbers = #tpu.dot_dimension_numbers<[1], [0], [0], [1], [0, 0, 1, 1], [], []>} : vector<16x72xbf16>, vector<72x1088xbf16>, vector<16x1088xf32> -> vector<16x1088xf32>
    %c0_5 = arith.constant 0 : index
    %c1 = arith.constant 1 : index
    %c0_6 = arith.constant 0 : index
    %6 = vector.load %arg1[%c0_5, %c1, %c0_6] : memref<1x18x72xf32, #tpu.memory_space<vmem>>, vector<1x16x72xf32>
    %7 = vector.shape_cast %6 : vector<1x16x72xf32> to vector<16x72xf32>
    %8 = arith.truncf %7 : vector<16x72xf32> to vector<16x72xbf16>
    %c1_7 = arith.constant 1 : index
    %c0_8 = arith.constant 0 : index
    %c0_9 = arith.constant 0 : index
    %9 = vector.load %arg2[%c1_7, %c0_8, %c0_9] : memref<3x72x1088xbf16, #tpu.memory_space<vmem>>, vector<1x72x1088xbf16>
    %10 = vector.shape_cast %9 : vector<1x72x1088xbf16> to vector<72x1088xbf16>
    %cst_10 = arith.constant dense<0.000000e+00> : vector<16x1088xf32>
    %11 = tpu.matmul %8, %10, %cst_10 {dimension_numbers = #tpu.dot_dimension_numbers<[1], [0], [0], [1], [0, 0, 1, 1], [], []>} : vector<16x72xbf16>, vector<72x1088xbf16>, vector<16x1088xf32> -> vector<16x1088xf32>
    %12 = arith.addf %5, %11 : vector<16x1088xf32>
    %c0_11 = arith.constant 0 : index
    %c2 = arith.constant 2 : index
    %c0_12 = arith.constant 0 : index
    %13 = vector.load %arg1[%c0_11, %c2, %c0_12] : memref<1x18x72xf32, #tpu.memory_space<vmem>>, vector<1x16x72xf32>
    %14 = vector.shape_cast %13 : vector<1x16x72xf32> to vector<16x72xf32>
    %15 = arith.truncf %14 : vector<16x72xf32> to vector<16x72xbf16>
    %c2_13 = arith.constant 2 : index
    %c0_14 = arith.constant 0 : index
    %c0_15 = arith.constant 0 : index
    %16 = vector.load %arg2[%c2_13, %c0_14, %c0_15] : memref<3x72x1088xbf16, #tpu.memory_space<vmem>>, vector<1x72x1088xbf16>
    %17 = vector.shape_cast %16 : vector<1x72x1088xbf16> to vector<72x1088xbf16>
    %cst_16 = arith.constant dense<0.000000e+00> : vector<16x1088xf32>
    %18 = tpu.matmul %15, %17, %cst_16 {dimension_numbers = #tpu.dot_dimension_numbers<[1], [0], [0], [1], [0, 0, 1, 1], [], []>} : vector<16x72xbf16>, vector<72x1088xbf16>, vector<16x1088xf32> -> vector<16x1088xf32>
    %19 = arith.addf %12, %18 : vector<16x1088xf32>
    %20 = vector.extract_strided_slice %19 {offsets = [0, 0], sizes = [16, 512], strides = [1, 1]} : vector<16x1088xf32> to vector<16x512xf32>
    %21 = vector.extract_strided_slice %19 {offsets = [0, 512], sizes = [16, 576], strides = [1, 1]} : vector<16x1088xf32> to vector<16x576xf32>
    %c0_17 = arith.constant 0 : index
    %c0_18 = arith.constant 0 : index
    %22 = vector.load %arg4[%c0_17, %c0_18] : memref<1x576xf32, #tpu.memory_space<vmem>>, vector<1x576xf32>
    %23 = vector.broadcast %22 : vector<1x576xf32> to vector<16x576xf32>
    %24 = arith.addf %21, %23 : vector<16x576xf32>
    %cst_19 = arith.constant 0.000000e+00 : f32
    %25 = vector.broadcast %cst_19 : f32 to vector<16x576xf32>
    %26 = arith.maximumf %24, %25 : vector<16x576xf32>
    %cst_20 = arith.constant 0.000000e+00 : f32
    %27 = vector.broadcast %cst_20 : f32 to vector<1x1x576xf32>
    %c0_21 = arith.constant 0 : index
    %c0_22 = arith.constant 0 : index
    %c0_23 = arith.constant 0 : index
    %28 = vector.load %arg7[%c0_21, %c0_22, %c0_23] : memref<1x18x576xf32, #tpu.memory_space<vmem>>, vector<1x1x576xf32>
    tpu.vector_store %arg7[%c0_21, %c0_22, %c0_23], %27 {strides = array<i32>} : memref<1x18x576xf32, #tpu.memory_space<vmem>>, vector<1x1x576xf32>,
    %c0_24 = arith.constant 0 : index
    %c17 = arith.constant 17 : index
    %c0_25 = arith.constant 0 : index
    %29 = vector.load %arg7[%c0_24, %c17, %c0_25] : memref<1x18x576xf32, #tpu.memory_space<vmem>>, vector<1x1x576xf32>
    tpu.vector_store %arg7[%c0_24, %c17, %c0_25], %27 {strides = array<i32>} : memref<1x18x576xf32, #tpu.memory_space<vmem>>, vector<1x1x576xf32>,
    %30 = vector.shape_cast %26 : vector<16x576xf32> to vector<1x16x576xf32>
    %c0_26 = arith.constant 0 : index
    %c1_27 = arith.constant 1 : index
    %c0_28 = arith.constant 0 : index
    %31 = vector.load %arg7[%c0_26, %c1_27, %c0_28] : memref<1x18x576xf32, #tpu.memory_space<vmem>>, vector<1x16x576xf32>
    tpu.vector_store %arg7[%c0_26, %c1_27, %c0_28], %30 {strides = array<i32>} : memref<1x18x576xf32, #tpu.memory_space<vmem>>, vector<1x16x576xf32>,
    %c0_29 = arith.constant 0 : index
    %c0_30 = arith.constant 0 : index
    %c0_31 = arith.constant 0 : index
    %32 = vector.load %arg7[%c0_29, %c0_30, %c0_31] : memref<1x18x576xf32, #tpu.memory_space<vmem>>, vector<1x16x576xf32>
    %33 = vector.shape_cast %32 : vector<1x16x576xf32> to vector<16x576xf32>
    %34 = arith.truncf %33 : vector<16x576xf32> to vector<16x576xbf16>
    %c0_32 = arith.constant 0 : index
    %c0_33 = arith.constant 0 : index
    %c0_34 = arith.constant 0 : index
    %35 = vector.load %arg3[%c0_32, %c0_33, %c0_34] : memref<3x576x512xbf16, #tpu.memory_space<vmem>>, vector<1x576x512xbf16>
    %36 = vector.shape_cast %35 : vector<1x576x512xbf16> to vector<576x512xbf16>
    %cst_35 = arith.constant dense<0.000000e+00> : vector<16x512xf32>
    %37 = tpu.matmul %34, %36, %cst_35 {dimension_numbers = #tpu.dot_dimension_numbers<[1], [0], [0], [1], [0, 0, 1, 1], [], []>} : vector<16x576xbf16>, vector<576x512xbf16>, vector<16x512xf32> -> vector<16x512xf32>
    %c0_36 = arith.constant 0 : index
    %c1_37 = arith.constant 1 : index
    %c0_38 = arith.constant 0 : index
    %38 = vector.load %arg7[%c0_36, %c1_37, %c0_38] : memref<1x18x576xf32, #tpu.memory_space<vmem>>, vector<1x16x576xf32>
    %39 = vector.shape_cast %38 : vector<1x16x576xf32> to vector<16x576xf32>
    %40 = arith.truncf %39 : vector<16x576xf32> to vector<16x576xbf16>
    %c1_39 = arith.constant 1 : index
    %c0_40 = arith.constant 0 : index
    %c0_41 = arith.constant 0 : index
    %41 = vector.load %arg3[%c1_39, %c0_40, %c0_41] : memref<3x576x512xbf16, #tpu.memory_space<vmem>>, vector<1x576x512xbf16>
    %42 = vector.shape_cast %41 : vector<1x576x512xbf16> to vector<576x512xbf16>
    %cst_42 = arith.constant dense<0.000000e+00> : vector<16x512xf32>
    %43 = tpu.matmul %40, %42, %cst_42 {dimension_numbers = #tpu.dot_dimension_numbers<[1], [0], [0], [1], [0, 0, 1, 1], [], []>} : vector<16x576xbf16>, vector<576x512xbf16>, vector<16x512xf32> -> vector<16x512xf32>
    %44 = arith.addf %37, %43 : vector<16x512xf32>
    %c0_43 = arith.constant 0 : index
    %c2_44 = arith.constant 2 : index
    %c0_45 = arith.constant 0 : index
    %45 = vector.load %arg7[%c0_43, %c2_44, %c0_45] : memref<1x18x576xf32, #tpu.memory_space<vmem>>, vector<1x16x576xf32>
    %46 = vector.shape_cast %45 : vector<1x16x576xf32> to vector<16x576xf32>
    %47 = arith.truncf %46 : vector<16x576xf32> to vector<16x576xbf16>
    %c2_46 = arith.constant 2 : index
    %c0_47 = arith.constant 0 : index
    %c0_48 = arith.constant 0 : index
    %48 = vector.load %arg3[%c2_46, %c0_47, %c0_48] : memref<3x576x512xbf16, #tpu.memory_space<vmem>>, vector<1x576x512xbf16>
    %49 = vector.shape_cast %48 : vector<1x576x512xbf16> to vector<576x512xbf16>
    %cst_49 = arith.constant dense<0.000000e+00> : vector<16x512xf32>
    %50 = tpu.matmul %47, %49, %cst_49 {dimension_numbers = #tpu.dot_dimension_numbers<[1], [0], [0], [1], [0, 0, 1, 1], [], []>} : vector<16x576xbf16>, vector<576x512xbf16>, vector<16x512xf32> -> vector<16x512xf32>
    %51 = arith.addf %44, %50 : vector<16x512xf32>
    %52 = arith.addf %20, %51 : vector<16x512xf32>
    %c0_50 = arith.constant 0 : index
    %c0_51 = arith.constant 0 : index
    %53 = vector.load %arg5[%c0_50, %c0_51] : memref<1x512xf32, #tpu.memory_space<vmem>>, vector<1x512xf32>
    %54 = vector.broadcast %53 : vector<1x512xf32> to vector<16x512xf32>
    %55 = arith.addf %52, %54 : vector<16x512xf32>
    %cst_52 = arith.constant 0.000000e+00 : f32
    %56 = vector.broadcast %cst_52 : f32 to vector<16x512xf32>
    %57 = arith.maximumf %55, %56 : vector<16x512xf32>
    %58 = vector.shape_cast %57 : vector<16x512xf32> to vector<1x16x512xf32>
    %c0_53 = arith.constant 0 : index
    %c0_54 = arith.constant 0 : index
    %c0_55 = arith.constant 0 : index
    %59 = vector.load %arg6[%c0_53, %c0_54, %c0_55] : memref<1x16x512xf32, #tpu.memory_space<vmem>>, vector<1x16x512xf32>
    tpu.vector_store %arg6[%c0_53, %c0_54, %c0_55], %58 {strides = array<i32>} : memref<1x16x512xf32, #tpu.memory_space<vmem>>, vector<1x16x512xf32>,
    return
  }
  func.func @transform_0(%arg0: i32) -> (i32, i32, i32) {
    %c0_i32 = arith.constant 0 : i32
    %c0_i32_0 = arith.constant 0 : i32
    %c0_i32_1 = arith.constant 0 : i32
    return %arg0, %c0_i32, %c0_i32_0 : i32, i32, i32
  }
  func.func @transform_1(%arg0: i32) -> (i32, i32, i32) {
    %c0_i32 = arith.constant 0 : i32
    %c0_i32_0 = arith.constant 0 : i32
    %c0_i32_1 = arith.constant 0 : i32
    %c0_i32_2 = arith.constant 0 : i32
    return %c0_i32, %c0_i32_0, %c0_i32_1 : i32, i32, i32
  }
  func.func @transform_2(%arg0: i32) -> (i32, i32, i32) {
    %c0_i32 = arith.constant 0 : i32
    %c0_i32_0 = arith.constant 0 : i32
    %c0_i32_1 = arith.constant 0 : i32
    %c0_i32_2 = arith.constant 0 : i32
    return %c0_i32, %c0_i32_0, %c0_i32_1 : i32, i32, i32
  }
  func.func @transform_3(%arg0: i32) -> (i32, i32) {
    %c0_i32 = arith.constant 0 : i32
    %c0_i32_0 = arith.constant 0 : i32
    %c0_i32_1 = arith.constant 0 : i32
    return %c0_i32, %c0_i32_0 : i32, i32
  }
  func.func @transform_4(%arg0: i32) -> (i32, i32) {
    %c0_i32 = arith.constant 0 : i32
    %c0_i32_0 = arith.constant 0 : i32
    %c0_i32_1 = arith.constant 0 : i32
    return %c0_i32, %c0_i32_0 : i32, i32
  }
  func.func @transform_5(%arg0: i32) -> (i32, i32, i32) {
    %c0_i32 = arith.constant 0 : i32
    %c0_i32_0 = arith.constant 0 : i32
    %c0_i32_1 = arith.constant 0 : i32
    return %arg0, %c0_i32, %c0_i32_0 : i32, i32, i32
  }
}

</mosaic_0001>

<bundles_post_ra>
// kernel: mask_conv_forward.1
= control target key start
LH: loop header
LB: loop body
LE: loop exit
PB: predicated region body
PF: predicated region fallthrough
CT: control target
= control target key end

     0   :  { %s7540_s18 = smov 0   ;;  %s9506_s0 = inlined_call_operand.vmem [shape: f32[2,18,72], index: 0, kind: input, shape index: {}]   ;;  %s9507_s1 = inlined_call_operand.vmem [shape: bf16[3,72,1088], index: 1, kind: input, shape index: {}]   ;;  %s9508_s2 = inlined_call_operand.vmem [shape: bf16[3,576,512], index: 2, kind: input, shape index: {}]   ;;  %s9509_s3 = inlined_call_operand.vmem [shape: f32[1,576], index: 3, kind: input, shape index: {}]   ;;  %s9510_s4 = inlined_call_operand.vmem [shape: f32[1,512], index: 4, kind: input, shape index: {}]   ;;  %s9511_s5 = inlined_call_operand.vmem [shape: f32[2,16,512], index: 5, kind: output, shape index: {}]  }
   0x1 LB: > { %s5501_s19 = sadd.s32 4294967295, %s7505_s18   ;;  %p5505_p0 = scmp.ge.s32.totalorder %s7505_s18, 1  ;;  %s7505_s18 = sphi %s7540_s18, %s15_s18  }
   0x2   : > { %p187_p1 = scmp.lt.s32.totalorder %s7505_s18, 3 }
   0x4   : > { %p188_p2 = pnand %p5505_p0, %p187_p1 }
   0x5   : > { %v6666_v0 = vld [vmem:[%s9507_s1 + $0x148] ss:$36 sps:$4 sm:$0xff] (!%p188_p2)   ;;  %v6668_v1 = vld [vmem:[%s9507_s1 + $0x150] ss:$36 sps:$4 sm:$0xff] (!%p188_p2)   ;;  %v7507_v2 = vmov (!%p188_p2), 0   ;;  %p215_p3 = scmp.lt.s32.totalorder (!%p188_p2), %s5501_s19, 1 }
   0x6   : > { %191 = sbr.rel (%p188_p2) target bundleno = 1059 (0x423), region = 40  ;;  %594 = vmatprep.mubr.bf16.mxu0 (!%p188_p2), %v7507_v2  ;;  %637 = vmatprep.mubr.bf16.mxu1 (!%p188_p2), %v7507_v2  ;;  %v6670_v3 = vld [vmem:[%s9507_s1 + $0x144] ss:$36 sps:$4 sm:$0xff] (!%p188_p2)   ;;  %v6671_v4 = vld [vmem:[%s9507_s1 + $0x14c] ss:$36 sps:$4 sm:$0xff] (!%p188_p2)   ;;  %vm534_vm0 = vcmask (!%p188_p2), 1043456  }
   0x7   : > { %562 = vmatprep.subr.bf16.mxu0 (!%p188_p2), %v6666_v0  ;;  %605 = vmatprep.subr.bf16.mxu1 (!%p188_p2), %v6668_v1  ;;  %v6672_v5 = vld [vmem:[%s9507_s1 + $0x190] ss:$36 sps:$4 sm:$0xff] (!%p188_p2)   ;;  %v6674_v6 = vld [vmem:[%s9507_s1 + $0x198] ss:$36 sps:$4 sm:$0xff] (!%p188_p2)   ;;  %v6680_v10 = vld [vmem:[%s9507_s1 + $0x1e0] ss:$36 sps:$4 sm:$0xff] (!%p188_p2)  }
   0x8   : > { %563 = vmatpush1.bf16.msra.mxu0 (!%p188_p2), %v6670_v3  ;;  %606 = vmatpush1.bf16.msra.mxu1 (!%p188_p2), %v6671_v4  ;;  %v6676_v7 = vld [vmem:[%s9507_s1 + $0x18c] ss:$36 sps:$4 sm:$0xff] (!%p188_p2)   ;;  %v6677_v8 = vld [vmem:[%s9507_s1 + $0x194] ss:$36 sps:$4 sm:$0xff] (!%p188_p2)   ;;  %v6683_v12 = vld [vmem:[%s9507_s1 + $0x1dc] ss:$36 sps:$4 sm:$0xff] (!%p188_p2)  }
   0x9   : > { %564 = vmatprep.subr.bf16.mxu0 (!%p188_p2), %v6672_v5  ;;  %607 = vmatprep.subr.bf16.mxu1 (!%p188_p2), %v6674_v6  ;;  %v6678_v9 = vld [vmem:[%s9507_s1 + $0x1d8] ss:$36 sps:$4 sm:$0xff] (!%p188_p2)   ;;  %v6684_v13 = vld [vmem:[%s9507_s1 + $0x220] ss:$36 sps:$4 sm:$0xff] (!%p188_p2)   ;;  %v6686_v14 = vld [vmem:[%s9507_s1 + $0x228] ss:$36 sps:$4 sm:$0xff] (!%p188_p2)  }
   0xa   : > { %v6682_v11 = vld [vmem:[%s9507_s1 + $0x1d4] ss:$36 sps:$4 sm:$0xff] (!%p188_p2)   ;;  %v5549_v15 = vld [vmem:[%s9507_s1 + $0x264] sm:$0xff] (!%p188_p2)  ;;  %v5550_v16 = vld [vmem:[%s9507_s1 + $0x26c] sm:$0xff] (!%p188_p2)  ;;  %vm530_vm1 = vcmask (!%p188_p2), 588800   ;;  %v7508_v55 = vmov (!%p188_p2), 0.0  }
   0xb   : > { %v6688_v17 = vld [vmem:[%s9507_s1 + $0x21c] ss:$36 sps:$4 sm:$0xff] (!%p188_p2)   ;;  %v6689_v18 = vld [vmem:[%s9507_s1 + $0x224] ss:$36 sps:$4 sm:$0xff] (!%p188_p2)   ;;  %v5591_v19 = vcombine.high (!%p188_p2), %v5549_v15, %v5549_v15  ;;  %v5593_v20 = vcombine.high (!%p188_p2), %v5550_v16, %v5550_v16  ;;  %v5590_v21 = vcombine.low (!%p188_p2), %v5549_v15, %v5549_v15  ;;  %v5592_v22 = vcombine.low (!%p188_p2), %v5550_v16, %v5550_v16  ;;  %v6694_v29 = vld [vmem:[%s9507_s1 + $0x154] ss:$36 sps:$4 sm:$0xff] (!%p188_p2)  }
   0xc   : > { %565 = vmatpush1.bf16.msra.mxu0 (!%p188_p2), %v6676_v7  ;;  %608 = vmatpush1.bf16.msra.mxu1 (!%p188_p2), %v6677_v8  ;;  %v6696_v23 = vld [vmem:[%s9507_s1 + $0x158] ss:$36 sps:$4 sm:$0xff] (!%p188_p2)   ;;  %v6699_v28 = vld [vmem:[%s9507_s1 + $0x160] ss:$36 sps:$4 sm:$0xff] (!%p188_p2)   ;;  %v6705_v33 = vld [vmem:[%s9507_s1 + $0x1a8] ss:$36 sps:$4 sm:$0xff] (!%p188_p2)  }
   0xd   : > { %s9513_s19 = smov (!%p215_p3, %s5501_s19), 1  ;;  %566 = vmatprep.subr.bf16.mxu0 %v6678_v9  ;;  %609 = vmatprep.subr.bf16.mxu1 %v6680_v10  ;;  %v536_v26 = vsel %vm534_vm0, %v5590_v21, 0  ;;  %v542_v27 = vsel %vm534_vm0, %v5592_v22, 0  ;;  %v6697_v30 = vld [vmem:[%s9507_s1 + $0x15c] ss:$36 sps:$4 sm:$0xff]   ;;  %v5551_v42 = vld [vmem:[%s9507_s1 + $0x274] sm:$0xff] }
   0xe   : > { %s6654_s23 = smul.u32 24, %s9513_s19  ;;  %v6702_v32 = vld [vmem:[%s9507_s1 + $0x1a0] ss:$36 sps:$4 sm:$0xff]   ;;  %v6708_v36 = vld [vmem:[%s9507_s1 + $0x1e8] ss:$36 sps:$4 sm:$0xff]   ;;  %v5595_v46 = vcombine.high %v5551_v42, %v5551_v42  ;;  %v5594_v48 = vcombine.low %v5551_v42, %v5551_v42  ;;  %vm7509_vm2 = vmmov 0  }
   0xf   : > { %v6700_v34 = vld [vmem:[%s9507_s1 + $0x19c] ss:$36 sps:$4 sm:$0xff]   ;;  %v6703_v35 = vld [vmem:[%s9507_s1 + $0x1a4] ss:$36 sps:$4 sm:$0xff]   ;;  %v6711_v37 = vld [vmem:[%s9507_s1 + $0x1f0] ss:$36 sps:$4 sm:$0xff]  }
  0x10   : > { %567 = vmatpush1.bf16.msra.mxu0 %v6682_v11  ;;  %610 = vmatpush1.bf16.msra.mxu1 %v6683_v12  ;;  %s7610_s11 = scalar_lea.vmem %s9506_s0, %s6654_s23  ;;  %v6706_v38 = vld [vmem:[%s9507_s1 + $0x1e4] ss:$36 sps:$4 sm:$0xff]   ;;  %v6709_v39 = vld [vmem:[%s9507_s1 + $0x1ec] ss:$36 sps:$4 sm:$0xff]   ;;  %v6717_v41 = vld [vmem:[%s9507_s1 + $0x238] ss:$36 sps:$4 sm:$0xff]  }
  0x11   : > { %568 = vmatprep.subr.bf16.mxu0 %v6684_v13  ;;  %611 = vmatprep.subr.bf16.mxu1 %v6686_v14  ;;  %v274_v24 = vld [vmem:[%s7610_s11 + $0x1] sm:$0xff]  ;;  %v275_v25 = vld [vmem:[%s7610_s11 + $0x9] sm:$0xff]  ;;  %v6715_v45 = vld [vmem:[%s9507_s1 + $0x234] ss:$36 sps:$4 sm:$0xff]   ;;  %v548_v50 = vsel %vm534_vm0, %v5594_v48, 0  ;;  %vm1808_vm4 = vcmask 1040384  }
  0x12   : > { %v7630_v31 = vpack.c.bf16 %v275_v25, %v274_v24  ;;  %v6714_v40 = vld [vmem:[%s9507_s1 + $0x230] ss:$36 sps:$4 sm:$0xff]   ;;  %v5552_v43 = vld [vmem:[%s9507_s1 + $0x27c] sm:$0xff]  ;;  %v6722_v53 = vld [vmem:[%s9507_s1 + $0x8] ss:$36 sps:$4 sm:$0xff]   ;;  %vm1843_vm6 = vcmask 523265  }
  0x13   : > { %v6712_v44 = vld [vmem:[%s9507_s1 + $0x22c] ss:$36 sps:$4 sm:$0xff]   ;;  %v5597_v47 = vcombine.high %v5552_v43, %v5552_v43  ;;  %v5596_v49 = vcombine.low %v5552_v43, %v5552_v43  ;;  %v6725_v54 = vld [vmem:[%s9507_s1 + $0x164] ss:$36 sps:$4 sm:$0xff]   ;;  %v6728_v56 = vld [vmem:[%s9507_s1 + $0x54] ss:$36 sps:$4 sm:$0xff]  }
  0x14   : > { %569 = vmatpush1.bf16.msra.mxu0 %v6688_v17  ;;  %612 = vmatpush1.bf16.msra.mxu1 %v6689_v18  ;;  %v6724_v52 = vld [vmem:[%s9507_s1 + $0xc] ss:$36 sps:$4 sm:$0xff]   ;;  %v6732_v59 = vld [vmem:[%s9507_s1 + $0x9c] ss:$36 sps:$4 sm:$0xff]   ;;  %v6733_v61 = vld [vmem:[%s9507_s1 + $0x1f4] ss:$36 sps:$4 sm:$0xff]  }
  0x15   : > { %5599 = vmatprep.subr.msk.bf16.mxu0 %vm534_vm0, %v5591_v19  ;;  %5601 = vmatprep.subr.msk.bf16.mxu1 %vm534_vm0, %v5593_v20  ;;  %v554_v51 = vsel %vm534_vm0, %v5596_v49, 0  ;;  %v6726_v57 = vld [vmem:[%s9507_s1 + $0x50] ss:$36 sps:$4 sm:$0xff]   ;;  %v6730_v60 = vld [vmem:[%s9507_s1 + $0x98] ss:$36 sps:$4 sm:$0xff]   ;;  %v270_v63 = vld [vmem:[%s9507_s1 + $0x128] sm:$0xff] }
  0x16   : > { %v6729_v58 = vld [vmem:[%s9507_s1 + $0x1ac] ss:$36 sps:$4 sm:$0xff]   ;;  %v6736_v62 = vld [vmem:[%s9507_s1 + $0xe4] ss:$36 sps:$4 sm:$0xff]   ;;  %v6737_v1 = vld [vmem:[%s9507_s1 + $0x23c] ss:$36 sps:$4 sm:$0xff]   ;;  %v5647_v3 = vcombine.high %v270_v63, %v270_v63  ;;  %v5646_v5 = vcombine.low %v270_v63, %v270_v63 }
  0x17   : > { %v6734_v0 = vld [vmem:[%s9507_s1 + $0xe0] ss:$36 sps:$4 sm:$0xff]   ;;  %v227_v8 = vld [vmem:[%s7610_s11 + $0x8] sm:$0xff]  ;;  %v6744_v13 = vld [vmem:[%s9507_s1 + $0x18] ss:$36 sps:$4 sm:$0xff]   ;;  %vm1855_vm7 = vcmask 516096  }
  0x18   : > { %571 = vmatpush1.bf16.msra.mxu0 %v536_v26  ;;  %614 = vmatpush1.bf16.msra.mxu1 %v542_v27  ;;  %v6739_v4 = vld [vmem:[%s9507_s1 + $0x284] ss:$0 sps:$4 sm:$0xff]   ;;  %v992_v10 = vsel %vm534_vm0, %v5646_v5, 0  ;;  %v6746_v11 = vld [vmem:[%s9507_s1 + $0x1c] ss:$36 sps:$4 sm:$0xff]   ;;  %v5702_v5 = vld [vmem:[%s9507_s1 + $0x3a8] sm:$0xff] }
  0x19   : > { %648 = vmatprep.subr.bf16.mxu0 %v6696_v23  ;;  %691 = vmatprep.subr.bf16.mxu1 %v6699_v28  ;;  %v6743_v6 = vld [vmem:[%s9507_s1 + $0x4] ss:$36 sps:$4 sm:$0xff]   ;;  %v560_v9 = vsel %vm534_vm0, %v6739_v4, 0  ;;  %v6749_v15 = vld [vmem:[%s9507_s1 + $0x4c] ss:$36 sps:$4 sm:$0xff]   ;;  %v272_v26 = vld [vmem:[%s9507_s1 + $0x138] sm:$0xff] }
  0x1a   : > { %v226_v7 = vld [vmem:[%s7610_s11] sm:$0xff]  ;;  %v6747_v17 = vld [vmem:[%s9507_s1 + $0x48] ss:$36 sps:$4 sm:$0xff]   ;;  %v6755_v19 = vld [vmem:[%s9507_s1 + $0x94] ss:$36 sps:$4 sm:$0xff]   ;;  %vm1849_vm8 = vcmask 523264  }
  0x1b   : > { %5600 = vmatmul.mubr.msk.bf16.vlgmr.msra.gmra.mrb[0].mxu0 %vm530_vm1, %v7630_v31  ;;  %5602 = vmatmul.mubr.msk.bf16.vlgmr.msra.gmra.mrb[0].mxu1 %vm530_vm1, %v7630_v31  ;;  %v6741_v12 = vld [vmem:[%s9507_s1] ss:$36 sps:$4 sm:$0xff]   ;;  %v7755_v14 = vpack.c.bf16 %v227_v8, %v226_v7  ;;  %v6758_v20 = vld [vmem:[%s9507_s1 + $0xac] ss:$36 sps:$4 sm:$0xff]   ;;  %v6764_v24 = vld [vmem:[%s9507_s1 + $0xf4] ss:$36 sps:$4 sm:$0xff]  }
  0x1c   : > { %649 = vmatpush1.bf16.msra.mxu0 %v6694_v29  ;;  %692 = vmatpush1.bf16.msra.mxu1 %v6697_v30  ;;  %v6752_v16 = vld [vmem:[%s9507_s1 + $0x64] ss:$36 sps:$4 sm:$0xff]   ;;  %v6753_v21 = vld [vmem:[%s9507_s1 + $0x90] ss:$36 sps:$4 sm:$0xff]   ;;  %v6761_v23 = vld [vmem:[%s9507_s1 + $0xdc] ss:$36 sps:$4 sm:$0xff]   ;;  %v5651_v30 = vcombine.high %v272_v26, %v272_v26 }
  0x1d   : > { %650 = vmatprep.subr.bf16.mxu0 %v6702_v32  ;;  %693 = vmatprep.subr.bf16.mxu1 %v6705_v33  ;;  %v6750_v18 = vld [vmem:[%s9507_s1 + $0x60] ss:$36 sps:$4 sm:$0xff]   ;;  %v6756_v22 = vld [vmem:[%s9507_s1 + $0xa8] ss:$36 sps:$4 sm:$0xff]   ;;  %v6759_v27 = vld [vmem:[%s9507_s1 + $0xd8] ss:$36 sps:$4 sm:$0xff]   ;;  %v5650_v32 = vcombine.low %v272_v26, %v272_v26 }
  0x1e   : > { %680 = vmatprep.mubr.bf16.mxu0 %v7507_v2  ;;  %723 = vmatprep.mubr.bf16.mxu1 %v7507_v2  ;;  %v269_v25 = vld [vmem:[%s9507_s1 + $0x120] sm:$0xff]  ;;  %v6762_v28 = vld [vmem:[%s9507_s1 + $0xf0] ss:$36 sps:$4 sm:$0xff]   ;;  %v6809_v8 = vld [vmem:[%s9507_s1 + $0x368] ss:$36 sps:$4 sm:$0xff]   ;;  %vm4383_vm9 = vcmask 1046528  }
  0x1f   : > { %v5645_v29 = vcombine.high %v269_v25, %v269_v25  ;;  %v6777_v42 = vld [vmem:[%s9507_s1 + $0xa0] ss:$36 sps:$4 sm:$0xff]   ;;  %v6780_v43 = vld [vmem:[%s9507_s1 + $0xb0] ss:$36 sps:$4 sm:$0xff]   ;;  %vm2181_vm5 = vsmask.f32 7424 }
  0x20   : > { %651 = vmatpush1.bf16.msra.mxu0 %v6700_v34  ;;  %694 = vmatpush1.bf16.msra.mxu1 %v6703_v35  ;;  %v1004_v34 = vsel %vm534_vm0, %v5650_v32, 0  ;;  %v6771_v35 = vld [vmem:[%s9507_s1 + $0x14] ss:$36 sps:$4 sm:$0xff]   ;;  %v6787_v48 = vld [vmem:[%s9507_s1 + $0x140] ss:$0 sps:$4 sm:$0xff]   ;;  %s6489_s16 = sshll.u32 %s9513_s19, 6 }
  0x21   : > { %652 = vmatprep.subr.bf16.mxu0 %v6708_v36  ;;  %695 = vmatprep.subr.bf16.mxu1 %v6711_v37  ;;  %v6769_v36 = vld [vmem:[%s9507_s1 + $0x10] ss:$36 sps:$4 sm:$0xff]   ;;  %v6772_v37 = vld [vmem:[%s9507_s1 + $0x20] ss:$36 sps:$4 sm:$0xff]   ;;  %v5704_v32 = vld [vmem:[%s9507_s1 + $0x3b8] sm:$0xff]  ;;  %s224_s21 = scalar_lea.vmem %s9511_s5, %s6489_s16 }
  0x22   : > { %v6805_v63 = vld [vmem:[%s9507_s1 + $0x324] ss:$36 sps:$4 sm:$0xff]   ;;  %v6811_v4 = vld [vmem:[%s9507_s1 + $0x36c] ss:$36 sps:$4 sm:$0xff]  }
  0x23   : > { %v6806_v7 = vld [vmem:[%s9507_s1 + $0x360] ss:$36 sps:$4 sm:$0xff]   ;;  %v6830_v26 = vld [vmem:[%s9507_s1 + $0x32c] ss:$36 sps:$4 sm:$0xff]  }
  0x24   : > { %653 = vmatpush1.bf16.msra.mxu0 %v6706_v38  ;;  %696 = vmatpush1.bf16.msra.mxu1 %v6709_v39  ;;  %v6775_v38 = vld [vmem:[%s9507_s1 + $0x5c] ss:$36 sps:$4 sm:$0xff]  }
  0x25   : > { %654 = vmatprep.subr.bf16.mxu0 %v6714_v40  ;;  %697 = vmatprep.subr.bf16.mxu1 %v6717_v41  ;;  %v6773_v39 = vld [vmem:[%s9507_s1 + $0x58] ss:$36 sps:$4 sm:$0xff]   ;;  %v6776_v40 = vld [vmem:[%s9507_s1 + $0x68] ss:$36 sps:$4 sm:$0xff]  }
  0x26   : > { %v6779_v41 = vld [vmem:[%s9507_s1 + $0xa4] ss:$36 sps:$4 sm:$0xff]  }
  0x28   : > { %655 = vmatpush1.bf16.msra.mxu0 %v6712_v44  ;;  %698 = vmatpush1.bf16.msra.mxu1 %v6715_v45  ;;  %v6783_v44 = vld [vmem:[%s9507_s1 + $0xec] ss:$36 sps:$4 sm:$0xff]  }
  0x29   : > { %5603 = vmatprep.subr.msk.bf16.mxu0 %vm534_vm0, %v5595_v46  ;;  %5605 = vmatprep.subr.msk.bf16.mxu1 %vm534_vm0, %v5597_v47  ;;  %v271_v45 = vld [vmem:[%s9507_s1 + $0x130] sm:$0xff]  ;;  %v6781_v46 = vld [vmem:[%s9507_s1 + $0xe8] ss:$36 sps:$4 sm:$0xff]   ;;  %v6784_v47 = vld [vmem:[%s9507_s1 + $0xf8] ss:$36 sps:$4 sm:$0xff]  }
  0x2a   : > { %v5649_v49 = vcombine.high %v271_v45, %v271_v45 }
  0x2c   : > { %657 = vmatpush1.bf16.msra.mxu0 %v548_v50  ;;  %700 = vmatpush1.bf16.msra.mxu1 %v554_v51  ;;  %v5648_v50 = vcombine.low %v271_v45, %v271_v45  ;;  %v6790_v51 = vld [vmem:[%s9507_s1 + $0x28c] ss:$36 sps:$4 sm:$0xff]   ;;  %v6847_v45 = vld [vmem:[%s9507_s1 + $0x380] ss:$36 sps:$4 sm:$0xff]  }
  0x2d   : > { %6508 = vmatprep.subr.bf16.mxu0 %v7508_v55  ;;  %1055 = vmatprep.subr.bf16.mxu1 %v6724_v52  ;;  %v6793_v52 = vld [vmem:[%s9507_s1 + $0x294] ss:$36 sps:$4 sm:$0xff]  }
  0x2f   : > { %5604 = vmatmul.mubr.msk.bf16.vlgmr.msra.gmra.mrb[4].mxu0 %vm530_vm1, %v7630_v31  ;;  %5606 = vmatmul.mubr.msk.bf16.vlgmr.msra.gmra.mrb[4].mxu1 %vm530_vm1, %v7630_v31 }
  0x30   : > { %6509 = vmatpush3.bf16.msra.mxu0 %v6725_v54  ;;  %1056 = vmatpush1.bf16.msra.mxu1 %v6722_v53  ;;  %v998_v53 = vsel %vm534_vm0, %v5648_v50, 0  ;;  %v1010_v54 = vsel %vm534_vm0, %v6787_v48, 0  ;;  %v6851_v48 = vld [vmem:[%s9508_s2 + $0x484] ss:$16 sps:$4 sm:$0xff]   ;;  %v6852_v50 = vld [vmem:[%s9508_s2 + $0x4a0] ss:$16 sps:$4 sm:$0xff]  }
  0x31   : > { %6510 = vmatprep.subr.bf16.mxu0 %v7508_v55  ;;  %1057 = vmatprep.subr.bf16.mxu1 %v6728_v56  ;;  %v6788_v56 = vld [vmem:[%s9507_s1 + $0x288] ss:$36 sps:$4 sm:$0xff]  }
  0x32   : > { %6518 = vmatprep.mubr.msk.bf16.mxu0 %vm7509_vm2, %v7508_v55  ;;  %1087 = vmatprep.mubr.bf16.mxu1 %v7507_v2 }
  0x34   : > { %6511 = vmatpush3.bf16.msra.mxu0 %v6729_v58  ;;  %1058 = vmatpush1.bf16.msra.mxu1 %v6726_v57  ;;  %v6791_v57 = vld [vmem:[%s9507_s1 + $0x290] ss:$36 sps:$4 sm:$0xff]  }
  0x35   : > { %6512 = vmatprep.subr.bf16.mxu0 %v7508_v55  ;;  %1059 = vmatprep.subr.bf16.mxu1 %v6732_v59  ;;  %v6796_v58 = vld [vmem:[%s9507_s1 + $0x2d4] ss:$36 sps:$4 sm:$0xff]   ;;  %v6799_v59 = vld [vmem:[%s9507_s1 + $0x2dc] ss:$36 sps:$4 sm:$0xff]  }
  0x38   : > { %6513 = vmatpush3.bf16.msra.mxu0 %v6733_v61  ;;  %1060 = vmatpush1.bf16.msra.mxu1 %v6730_v60  ;;  %v6794_v60 = vld [vmem:[%s9507_s1 + $0x2d0] ss:$36 sps:$4 sm:$0xff]   ;;  %v6797_v61 = vld [vmem:[%s9507_s1 + $0x2d8] ss:$36 sps:$4 sm:$0xff]  }
  0x39   : > { %6514 = vmatprep.subr.bf16.mxu0 %v7508_v55  ;;  %1061 = vmatprep.subr.bf16.mxu1 %v6736_v62  ;;  %v6802_v62 = vld [vmem:[%s9507_s1 + $0x31c] ss:$36 sps:$4 sm:$0xff]  }
  0x3c   : > { %6515 = vmatpush3.bf16.msra.mxu0 %v6737_v1  ;;  %1062 = vmatpush1.bf16.msra.mxu1 %v6734_v0  ;;  %v6800_v0 = vld [vmem:[%s9507_s1 + $0x318] ss:$36 sps:$4 sm:$0xff]   ;;  %v6803_v1 = vld [vmem:[%s9507_s1 + $0x320] ss:$36 sps:$4 sm:$0xff]  }
  0x3d   : > { %6516 = vmatprep.subr.bf16.mxu0 %v7508_v55  ;;  %5655 = vmatprep.subr.msk.bf16.mxu1 %vm534_vm0, %v5647_v3  ;;  %v6808_v3 = vld [vmem:[%s9507_s1 + $0x364] ss:$36 sps:$4 sm:$0xff]  }
  0x40   : > { %6517 = vmatpush3.bf16.msra.mxu0 %v560_v9  ;;  %1064 = vmatpush1.bf16.msra.mxu1 %v992_v10  ;;  %v5744_v9 = vcombine.high %v5702_v5, %v5702_v5 }
  0x41   : > { %1012 = vmatprep.subr.bf16.mxu0 %v6743_v6  ;;  %1141 = vmatprep.subr.bf16.mxu1 %v6746_v11  ;;  %v5703_v6 = vld [vmem:[%s9507_s1 + $0x3b0] sm:$0xff]  ;;  %v5743_v11 = vcombine.low %v5702_v5, %v5702_v5 }
  0x42   : > { %v5746_v10 = vcombine.high %v5703_v6, %v5703_v6  ;;  %v6876_v5 = vld [vmem:[%s9508_s2 + $0x5a0] ss:$16 sps:$4 sm:$0xff]  }
  0x43   : > { %6519 = vmatmul.mubr.msk.bf16.vlgmr.msra.gmra.mrb[8].mxu0 %vm530_vm1, %v7630_v31  ;;  %5656 = vmatmul.mubr.msk.bf16.vlgmr.msra.gmra.mrb[0].mxu1 %vm530_vm1, %v7755_v14  ;;  %v5644_v31 = vcombine.low %v269_v25, %v269_v25  ;;  %v6825_v25 = vld [vmem:[%s9507_s1 + $0x2e8] ss:$36 sps:$4 sm:$0xff]  }
  0x44   : > { %1013 = vmatpush1.bf16.msra.mxu0 %v6741_v12  ;;  %1142 = vmatpush1.bf16.msra.mxu1 %v6744_v13  ;;  %v5745_v12 = vcombine.low %v5703_v6, %v5703_v6  ;;  %v1225_v13 = vld [vmem:[%s7610_s11 + $0x2] sm:$0xff] }
  0x45   : > { %1014 = vmatprep.subr.bf16.mxu0 %v6749_v15  ;;  %1143 = vmatprep.subr.bf16.mxu1 %v6752_v16  ;;  %v986_v33 = vsel %vm534_vm0, %v5644_v31, 0  ;;  %v6818_v15 = vld [vmem:[%s9507_s1 + $0x29c] ss:$36 sps:$4 sm:$0xff]   ;;  %v6821_v16 = vld [vmem:[%s9507_s1 + $0x2a4] ss:$36 sps:$4 sm:$0xff]  }
  0x46   : > { %1044 = vmatprep.mubr.bf16.mxu0 %v7507_v2  ;;  %1173 = vmatprep.mubr.bf16.mxu1 %v7507_v2  ;;  %v6839_v31 = vld [vmem:[%s9507_s1 + $0x37c] ss:$36 sps:$4 sm:$0xff]   ;;  %v6881_v6 = vld [vmem:[%s9508_s2 + $0x5c4] ss:$16 sps:$4 sm:$0xff]  }
  0x48   : > { %1015 = vmatpush1.bf16.msra.mxu0 %v6747_v17  ;;  %1144 = vmatpush1.bf16.msra.mxu1 %v6750_v18  ;;  %v1485_v17 = vsel %vm534_vm0, %v5743_v11, 0  ;;  %v1491_v18 = vsel %vm534_vm0, %v5745_v12, 0  ;;  %v6887_v11 = vld [vmem:[%s9508_s2 + $0x604] ss:$16 sps:$4 sm:$0xff]   ;;  %v6885_v12 = vld [vmem:[%s9508_s2 + $0x600] ss:$16 sps:$4 sm:$0xff]  }
  0x49   : > { %1016 = vmatprep.subr.bf16.mxu0 %v6755_v19  ;;  %1145 = vmatprep.subr.bf16.mxu1 %v6758_v20  ;;  %v6816_v19 = vld [vmem:[%s9507_s1 + $0x298] ss:$36 sps:$4 sm:$0xff]   ;;  %v6819_v20 = vld [vmem:[%s9507_s1 + $0x2a0] ss:$36 sps:$4 sm:$0xff]  }
  0x4c   : > { %1017 = vmatpush1.bf16.msra.mxu0 %v6753_v21  ;;  %1146 = vmatpush1.bf16.msra.mxu1 %v6756_v22  ;;  %v6824_v22 = vld [vmem:[%s9507_s1 + $0x2e4] ss:$36 sps:$4 sm:$0xff]  }
  0x4d   : > { %1018 = vmatprep.subr.bf16.mxu0 %v6761_v23  ;;  %1147 = vmatprep.subr.bf16.mxu1 %v6764_v24  ;;  %v6827_v23 = vld [vmem:[%s9507_s1 + $0x2ec] ss:$36 sps:$4 sm:$0xff]   ;;  %v6822_v24 = vld [vmem:[%s9507_s1 + $0x2e0] ss:$36 sps:$4 sm:$0xff]  }
  0x50   : > { %1019 = vmatpush1.bf16.msra.mxu0 %v6759_v27  ;;  %1148 = vmatpush1.bf16.msra.mxu1 %v6762_v28  ;;  %v6833_v27 = vld [vmem:[%s9507_s1 + $0x334] ss:$36 sps:$4 sm:$0xff]   ;;  %v6828_v28 = vld [vmem:[%s9507_s1 + $0x328] ss:$36 sps:$4 sm:$0xff]  }
  0x51   : > { %5653 = vmatprep.subr.msk.bf16.mxu0 %vm534_vm0, %v5645_v29  ;;  %5659 = vmatprep.subr.msk.bf16.mxu1 %vm534_vm0, %v5651_v30  ;;  %v6831_v29 = vld [vmem:[%s9507_s1 + $0x330] ss:$36 sps:$4 sm:$0xff]  }
  0x52   : > { %v6836_v30 = vld [vmem:[%s9507_s1 + $0x374] ss:$36 sps:$4 sm:$0xff]  }
  0x54   : > { %1021 = vmatpush1.bf16.msra.mxu0 %v986_v33  ;;  %1150 = vmatpush1.bf16.msra.mxu1 %v1004_v34  ;;  %v5705_v33 = vld [vmem:[%s9507_s1 + $0x3c0] sm:$0xff]  ;;  %v6834_v34 = vld [vmem:[%s9507_s1 + $0x370] ss:$36 sps:$4 sm:$0xff]  }
  0x55   : > { %1098 = vmatprep.subr.bf16.mxu0 %v6771_v35  ;;  %6522 = vmatprep.subr.bf16.mxu1 %v7508_v55  ;;  %v6837_v35 = vld [vmem:[%s9507_s1 + $0x378] ss:$36 sps:$4 sm:$0xff]  }
  0x57   : > { %5654 = vmatmul.mubr.msk.bf16.vlgmr.msra.gmra.mrb[0].mxu0 %vm530_vm1, %v7755_v14  ;;  %5660 = vmatmul.mubr.msk.bf16.vlgmr.msra.gmra.mrb[4].mxu1 %vm530_vm1, %v7755_v14 }
  0x58   : > { %1099 = vmatpush1.bf16.msra.mxu0 %v6769_v36  ;;  %6523 = vmatpush3.bf16.msra.mxu1 %v6772_v37  ;;  %v5748_v36 = vcombine.high %v5704_v32, %v5704_v32  ;;  %v5750_v37 = vcombine.high %v5705_v33, %v5705_v33 }
  0x59   : > { %1100 = vmatprep.subr.bf16.mxu0 %v6775_v38  ;;  %6524 = vmatprep.subr.bf16.mxu1 %v7508_v55  ;;  %v5747_v38 = vcombine.low %v5704_v32, %v5704_v32 }
  0x5a   : > { %6532 = vmatprep.mubr.msk.bf16.mxu1 %vm7509_vm2, %v7508_v55  ;;  %1130 = vmatprep.mubr.bf16.mxu0 %v7507_v2 }
  0x5c   : > { %1101 = vmatpush1.bf16.msra.mxu0 %v6773_v39  ;;  %6525 = vmatpush3.bf16.msra.mxu1 %v6776_v40  ;;  %v5749_v39 = vcombine.low %v5705_v33, %v5705_v33  ;;  %v1497_v40 = vsel %vm534_vm0, %v5747_v38, 0 }
  0x5d   : > { %1102 = vmatprep.subr.bf16.mxu0 %v6779_v41  ;;  %6526 = vmatprep.subr.bf16.mxu1 %v7508_v55 }
  0x5e   : > { %v1503_v41 = vsel %vm534_vm0, %v5749_v39, 0 }
  0x60   : > { %1103 = vmatpush1.bf16.msra.mxu0 %v6777_v42  ;;  %6527 = vmatpush3.bf16.msra.mxu1 %v6780_v43  ;;  %v6844_v42 = vld [vmem:[%s9507_s1 + $0x2a8] ss:$36 sps:$4 sm:$0xff]   ;;  %v6845_v43 = vld [vmem:[%s9507_s1 + $0x2f0] ss:$36 sps:$4 sm:$0xff]  }
  0x61   : > { %1104 = vmatprep.subr.bf16.mxu0 %v6783_v44  ;;  %6528 = vmatprep.subr.bf16.mxu1 %v7508_v55  ;;  %v6846_v44 = vld [vmem:[%s9507_s1 + $0x338] ss:$36 sps:$4 sm:$0xff]  }
  0x64   : > { %1105 = vmatpush1.bf16.msra.mxu0 %v6781_v46  ;;  %6529 = vmatpush3.bf16.msra.mxu1 %v6784_v47  ;;  %v6848_v46 = vld [vmem:[%s9507_s1 + $0x3c8] ss:$0 sps:$4 sm:$0xff]  }
  0x65   : > { %5657 = vmatprep.subr.msk.bf16.mxu0 %vm534_vm0, %v5649_v49  ;;  %6530 = vmatprep.subr.bf16.mxu1 %v7508_v55  ;;  %v1509_v47 = vsel %vm534_vm0, %v6848_v46, 0  ;;  %v6849_v49 = vld [vmem:[%s9508_s2 + $0x480] ss:$16 sps:$4 sm:$0xff]  }
  0x68   : > { %1107 = vmatpush1.bf16.msra.mxu0 %v998_v53  ;;  %6531 = vmatpush3.bf16.msra.mxu1 %v1010_v54  ;;  %v6855_v53 = vld [vmem:[%s9508_s2 + $0x4c0] ss:$16 sps:$4 sm:$0xff]   ;;  %v6860_v54 = vld [vmem:[%s9508_s2 + $0x4e4] ss:$16 sps:$4 sm:$0xff]  }
  0x69   : > { %1511 = vmatprep.subr.bf16.mxu0 %v6790_v51  ;;  %1554 = vmatprep.subr.bf16.mxu1 %v6793_v52  ;;  %v6854_v51 = vld [vmem:[%s9508_s2 + $0x4a4] ss:$16 sps:$4 sm:$0xff]  }
  0x6a   : > { %v6857_v52 = vld [vmem:[%s9508_s2 + $0x4c4] ss:$16 sps:$4 sm:$0xff]  }
  0x6b   : > { %6533 = vmatmul.mubr.msk.bf16.vlgmr.msra.gmra.mrb[8].mxu1 %vm530_vm1, %v7755_v14  ;;  %5658 = vmatmul.mubr.msk.bf16.vlgmr.msra.gmra.mrb[4].mxu0 %vm530_vm1, %v7755_v14  ;;  %v1226_v14 = vld [vmem:[%s7610_s11 + $0xa] sm:$0xff] }
  0x6c   : > { %1512 = vmatpush1.bf16.msra.mxu0 %v6788_v56  ;;  %1555 = vmatpush1.bf16.msra.mxu1 %v6791_v57  ;;  %v7944_v21 = vpack.c.bf16 %v1226_v14, %v1225_v13  ;;  %v6858_v56 = vld [vmem:[%s9508_s2 + $0x4e0] ss:$16 sps:$4 sm:$0xff]   ;;  %v6863_v57 = vld [vmem:[%s9508_s2 + $0x504] ss:$16 sps:$4 sm:$0xff]  }
  0x6d   : > { %1513 = vmatprep.subr.bf16.mxu0 %v6796_v58  ;;  %1556 = vmatprep.subr.bf16.mxu1 %v6799_v59  ;;  %v6861_v58 = vld [vmem:[%s9508_s2 + $0x500] ss:$16 sps:$4 sm:$0xff]   ;;  %v6866_v59 = vld [vmem:[%s9508_s2 + $0x524] ss:$16 sps:$4 sm:$0xff]  }
  0x6e   : > { %1543 = vmatprep.mubr.bf16.mxu0 %v7507_v2  ;;  %1586 = vmatprep.mubr.bf16.mxu1 %v7507_v2  ;;  %v6890_v13 = vld [vmem:[%s9508_s2 + $0x624] ss:$16 sps:$4 sm:$0xff]  }
  0x6f   : > { %v6893_v14 = vld [vmem:[%s9508_s2 + $0x644] ss:$16 sps:$4 sm:$0xff]  }
  0x70   : > { %1514 = vmatpush1.bf16.msra.mxu0 %v6794_v60  ;;  %1557 = vmatpush1.bf16.msra.mxu1 %v6797_v61  ;;  %v6864_v60 = vld [vmem:[%s9508_s2 + $0x520] ss:$16 sps:$4 sm:$0xff]   ;;  %v6869_v61 = vld [vmem:[%s9508_s2 + $0x544] ss:$16 sps:$4 sm:$0xff]  }
  0x71   : > { %1515 = vmatprep.subr.bf16.mxu0 %v6802_v62  ;;  %1558 = vmatprep.subr.bf16.mxu1 %v6805_v63  ;;  %v6867_v62 = vld [vmem:[%s9508_s2 + $0x540] ss:$16 sps:$4 sm:$0xff]   ;;  %v6872_v63 = vld [vmem:[%s9508_s2 + $0x564] ss:$16 sps:$4 sm:$0xff]  }
  0x74   : > { %1516 = vmatpush1.bf16.msra.mxu0 %v6800_v0  ;;  %1559 = vmatpush1.bf16.msra.mxu1 %v6803_v1  ;;  %v6870_v0 = vld [vmem:[%s9508_s2 + $0x560] ss:$16 sps:$4 sm:$0xff]   ;;  %v6875_v1 = vld [vmem:[%s9508_s2 + $0x584] ss:$16 sps:$4 sm:$0xff]  }
  0x75   : > { %1517 = vmatprep.subr.bf16.mxu0 %v6808_v3  ;;  %1560 = vmatprep.subr.bf16.mxu1 %v6811_v4  ;;  %v6873_v3 = vld [vmem:[%s9508_s2 + $0x580] ss:$16 sps:$4 sm:$0xff]   ;;  %v6878_v4 = vld [vmem:[%s9508_s2 + $0x5a4] ss:$16 sps:$4 sm:$0xff]  }
  0x78   : > { %1518 = vmatpush1.bf16.msra.mxu0 %v6806_v7  ;;  %1561 = vmatpush1.bf16.msra.mxu1 %v6809_v8  ;;  %v6879_v7 = vld [vmem:[%s9508_s2 + $0x5c0] ss:$16 sps:$4 sm:$0xff]   ;;  %v1744_v8 = vlaneseq }
  0x79   : > { %5752 = vmatprep.subr.msk.bf16.mxu0 %vm534_vm0, %v5744_v9  ;;  %5754 = vmatprep.subr.msk.bf16.mxu1 %vm534_vm0, %v5746_v10  ;;  %v6884_v9 = vld [vmem:[%s9508_s2 + $0x5e4] ss:$16 sps:$4 sm:$0xff]   ;;  %v6882_v10 = vld [vmem:[%s9508_s2 + $0x5e0] ss:$16 sps:$4 sm:$0xff]  }
  0x7a   : > { %vm1791_vm3 = vcmp.lt.s32.totalorder %v1744_v8, 576  ;;  %v8162_v38 = vshrl.u32 %v1744_v8, 7 }
  0x7b   : > { %1793 = vst.msk [vmem:[#allocation2] ss:$8 sm:$0xf] %vm1791_vm3, %v7508_v55  ;;  %1794 = vst.msk [vmem:[#allocation2] ss:$8 sm:$0x10] %vm1791_vm3, %v7508_v55 }
  0x7c   : > { %1520 = vmatpush1.bf16.msra.mxu0 %v1485_v17  ;;  %1563 = vmatpush1.bf16.msra.mxu1 %v1491_v18  ;;  %1796 = vst.msk [vmem:[#allocation2 + $0x51] ss:$8 sm:$0xf] %vm1791_vm3, %v7508_v55  ;;  %1797 = vst.msk [vmem:[#allocation2 + $0x51] ss:$8 sm:$0x10] %vm1791_vm3, %v7508_v55 }
  0x7d   : > { %1597 = vmatprep.subr.bf16.mxu0 %v6818_v15  ;;  %1640 = vmatprep.subr.bf16.mxu1 %v6821_v16  ;;  %v6891_v15 = vld [vmem:[%s9508_s2 + $0x640] ss:$16 sps:$4 sm:$0xff]   ;;  %v6896_v16 = vld [vmem:[%s9508_s2 + $0x664] ss:$16 sps:$4 sm:$0xff]   ;;  %v1746_v39 = vsub.s32 0, %v8162_v38 }
  0x7e   : > { %v6894_v17 = vld [vmem:[%s9508_s2 + $0x660] ss:$16 sps:$4 sm:$0xff]   ;;  %v6899_v18 = vld [vmem:[%s9508_s2 + $0x684] ss:$16 sps:$4 sm:$0xff]  }
  0x7f   : > { %5753 = vmatmul.mubr.msk.bf16.vlgmr.msra.gmra.mrb[0].mxu0 %vm530_vm1, %v7944_v21  ;;  %5755 = vmatmul.mubr.msk.bf16.vlgmr.msra.gmra.mrb[0].mxu1 %vm530_vm1, %v7944_v21 }
  0x80   : > { %1598 = vmatpush1.bf16.msra.mxu0 %v6816_v19  ;;  %1641 = vmatpush1.bf16.msra.mxu1 %v6819_v20  ;;  %v6905_v19 = vld [vmem:[%s9508_s2 + $0x884] ss:$16 sps:$4 sm:$0xff]   ;;  %v6903_v20 = vld [vmem:[%s9508_s2 + $0x880] ss:$16 sps:$4 sm:$0xff]  }
  0x81   : > { %1599 = vmatprep.subr.bf16.mxu0 %v6824_v22  ;;  %1642 = vmatprep.subr.bf16.mxu1 %v6827_v23  ;;  %v6909_v22 = vld [vmem:[%s9508_s2 + $0x8a0] ss:$16 sps:$4 sm:$0xff]   ;;  %v6917_v23 = vld [vmem:[%s9508_s2 + $0x8c4] ss:$16 sps:$4 sm:$0xff]  }
  0x82   : > { %1629 = vmatprep.mubr.bf16.mxu0 %v7507_v2  ;;  %1672 = vmatprep.mubr.bf16.mxu1 %v7507_v2 }
  0x84   : > { %1600 = vmatpush1.bf16.msra.mxu0 %v6822_v24  ;;  %1643 = vmatpush1.bf16.msra.mxu1 %v6825_v25  ;;  %v6915_v24 = vld [vmem:[%s9508_s2 + $0x8c0] ss:$16 sps:$4 sm:$0xff]   ;;  %v6923_v25 = vld [vmem:[%s9508_s2 + $0x8e4] ss:$16 sps:$4 sm:$0xff]  }
  0x85   : > { %1601 = vmatprep.subr.bf16.mxu0 %v6830_v26  ;;  %1644 = vmatprep.subr.bf16.mxu1 %v6833_v27  ;;  %v6921_v26 = vld [vmem:[%s9508_s2 + $0x8e0] ss:$16 sps:$4 sm:$0xff]   ;;  %v6929_v27 = vld [vmem:[%s9508_s2 + $0x48c] ss:$16 sps:$4 sm:$0xff]  }
  0x88   : > { %1602 = vmatpush1.bf16.msra.mxu0 %v6828_v28  ;;  %1645 = vmatpush1.bf16.msra.mxu1 %v6831_v29 }
  0x89   : > { %1603 = vmatprep.subr.bf16.mxu0 %v6836_v30  ;;  %1646 = vmatprep.subr.bf16.mxu1 %v6839_v31 }
  0x8c   : > { %1604 = vmatpush1.bf16.msra.mxu0 %v6834_v34  ;;  %1647 = vmatpush1.bf16.msra.mxu1 %v6837_v35 }
  0x8d   : > { %5756 = vmatprep.subr.msk.bf16.mxu0 %vm534_vm0, %v5748_v36  ;;  %5758 = vmatprep.subr.msk.bf16.mxu1 %vm534_vm0, %v5750_v37 }
  0x90   : > { %1606 = vmatpush1.bf16.msra.mxu0 %v1497_v40  ;;  %1649 = vmatpush1.bf16.msra.mxu1 %v1503_v41  ;;  %v1754_v40 = vsub.s32 2, %v8162_v38  ;;  %v1742_v41 = vld [vmem:[%s9509_s3] sm:$0x1f] }
  0x91   : > { %6536 = vmatprep.subr.bf16.mxu0 %v7508_v55  ;;  %3055 = vmatprep.subr.bf16.mxu1 %v6905_v19 }
  0x93   : > { %5757 = vmatmul.mubr.msk.bf16.vlgmr.msra.gmra.mrb[4].mxu0 %vm530_vm1, %v7944_v21  ;;  %5759 = vmatmul.mubr.msk.bf16.vlgmr.msra.gmra.mrb[4].mxu1 %vm530_vm1, %v7944_v21 }
  0x94   : > { %6537 = vmatpush3.bf16.msra.mxu0 %v6844_v42  ;;  %6546 = vmatprep.mubr.msk.bf16.mxu0 %vm7509_vm2, %v7508_v55  ;;  %v1750_v42 = vsub.s32 1, %v8162_v38 }
  0x95   : > { %6538 = vmatprep.subr.bf16.mxu0 %v7508_v55  ;;  %3087 = vmatprep.mubr.bf16.mxu1 %v7507_v2 }
  0x96   : > { %3056 = vmatpush1.bf16.msra.mxu1 %v6903_v20  ;;  %v1751_v46 = vrot.slane %v1742_v41, %v1750_v42 }
  0x98   : > { %6539 = vmatpush3.bf16.msra.mxu0 %v6845_v43  ;;  %v1758_v43 = vsub.s32 3, %v8162_v38 }
  0x99   : > { %6540 = vmatprep.subr.bf16.mxu0 %v7508_v55 }
  0x9c   : > { %6541 = vmatpush3.bf16.msra.mxu0 %v6846_v44  ;;  %v1747_v44 = vrot.slane %v1742_v41, %v1746_v39 }
  0x9d   : > { %6542 = vmatprep.subr.bf16.mxu0 %v7508_v55 }
  0xa0   : > { %6543 = vmatpush3.bf16.msra.mxu0 %v6847_v45  ;;  %v1755_v45 = vrot.slane %v1742_v41, %v1754_v40 }
  0xa1   : > { %6544 = vmatprep.subr.bf16.mxu0 %v7508_v55  ;;  %v6888_v55 = vld [vmem:[%s9508_s2 + $0x620] ss:$16 sps:$4 sm:$0xff]  }
  0xa4   : > { %6545 = vmatpush3.bf16.msra.mxu0 %v1509_v47  ;;  %v1759_v47 = vrot.slane %v1742_v41, %v1758_v43 }
  0xa5   : > { %2969 = vmatprep.subr.bf16.mxu0 %v6851_v48 }
  0xa7   : > { %6547 = vmatmul.mubr.msk.bf16.vlgmr.msra.gmra.mrb[12].mxu0 %vm530_vm1, %v7944_v21  ;;  %v6911_v21 = vld [vmem:[%s9508_s2 + $0x8a4] ss:$16 sps:$4 sm:$0xff]  }
  0xa8   : > { %2970 = vmatpush1.bf16.msra.mxu0 %v6849_v49  ;;  %3057 = vmatprep.subr.bf16.mxu1 %v6911_v21  ;;  %v1762_v21 = vsub.s32 4, %v8162_v38 }
  0xa9   : > { %2971 = vmatprep.subr.bf16.mxu0 %v6854_v51  ;;  %3058 = vmatpush1.bf16.msra.mxu1 %v6909_v22 }
  0xaa   : > { %3059 = vmatprep.subr.bf16.mxu1 %v6917_v23 }
  0xac   : > { %2972 = vmatpush1.bf16.msra.mxu0 %v6852_v50 }
  0xad   : > { %2973 = vmatprep.subr.bf16.mxu0 %v6857_v52  ;;  %3060 = vmatpush1.bf16.msra.mxu1 %v6915_v24 }
  0xae   : > { %3061 = vmatprep.subr.bf16.mxu1 %v6923_v25 }
  0xb0   : > { %2974 = vmatpush1.bf16.msra.mxu0 %v6855_v53 }
  0xb1   : > { %2975 = vmatprep.subr.bf16.mxu0 %v6860_v54  ;;  %3062 = vmatpush1.bf16.msra.mxu1 %v6921_v26 }
  0xb2   : > { %3098 = vmatprep.subr.bf16.mxu1 %v6929_v27  ;;  %v1763_v27 = vrot.slane %v1742_v41, %v1762_v21 }
  0xb4   : > { %2976 = vmatpush1.bf16.msra.mxu0 %v6858_v56 }
  0xb5   : > { %2977 = vmatprep.subr.bf16.mxu0 %v6863_v57 }
  0xb8   : > { %2978 = vmatpush1.bf16.msra.mxu0 %v6861_v58 }
  0xb9   : > { %2979 = vmatprep.subr.bf16.mxu0 %v6866_v59 }
  0xbc   : > { %2980 = vmatpush1.bf16.msra.mxu0 %v6864_v60 }
  0xbd   : > { %2981 = vmatprep.subr.bf16.mxu0 %v6869_v61 }
  0xc0   : > { %2982 = vmatpush1.bf16.msra.mxu0 %v6867_v62 }
  0xc1   : > { %2983 = vmatprep.subr.bf16.mxu0 %v6872_v63 }
  0xc4   : > { %2984 = vmatpush1.bf16.msra.mxu0 %v6870_v0 }
  0xc5   : > { %2985 = vmatprep.subr.bf16.mxu0 %v6875_v1 }
  0xc8   : > { %2986 = vmatpush1.bf16.msra.mxu0 %v6873_v3 }
  0xc9   : > { %2987 = vmatprep.subr.bf16.mxu0 %v6878_v4 }
  0xcc   : > { %2988 = vmatpush1.bf16.msra.mxu0 %v6876_v5 }
  0xcd   : > { %2989 = vmatprep.subr.bf16.mxu0 %v6881_v6 }
  0xd0   : > { %2990 = vmatpush1.bf16.msra.mxu0 %v6879_v7 }
  0xd1   : > { %2991 = vmatprep.subr.bf16.mxu0 %v6884_v9 }
  0xd4   : > { %2992 = vmatpush1.bf16.msra.mxu0 %v6882_v10 }
  0xd5   : > { %2993 = vmatprep.subr.bf16.mxu0 %v6887_v11 }
  0xd8   : > { %2994 = vmatpush1.bf16.msra.mxu0 %v6885_v12 }
  0xd9   : > { %2995 = vmatprep.subr.bf16.mxu0 %v6890_v13 }
  0xdc   : > { %2996 = vmatpush1.bf16.msra.mxu0 %v6888_v55 }
  0xdd   : > { %2997 = vmatprep.subr.bf16.mxu0 %v6893_v14 }
  0xe0   : > { %2998 = vmatpush1.bf16.msra.mxu0 %v6891_v15 }
  0xe1   : > { %2999 = vmatprep.subr.bf16.mxu0 %v6896_v16 }
  0xe4   : > { %3000 = vmatpush1.bf16.msra.mxu0 %v6894_v17 }
  0xe5   : > { %3012 = vmatprep.subr.bf16.mxu0 %v6899_v18 }
 0x116   : > { %v768_v28 = vpop.f32.mrb[8].mxu0 }
 0x117   : > { %v6520_v29 = vpop.f32.mrb[9].mxu0 }
 0x118   : > { %v771_v30 = vpop.f32.mrb[10].mxu0 }
 0x119   : > { %v6521_v31 = vpop.f32.mrb[11].mxu0 }
 0x13e   : > { %v1218_v32 = vpop.f32.mrb[8].mxu1 }
 0x13f   : > { %v8158_v33 = vadd.f32 %v1218_v32, %v768_v28  ;;  %v6534_v34 = vpop.f32.mrb[9].mxu1 }
 0x140   : > { %v1221_v35 = vpop.f32.mrb[10].mxu1 }
 0x141   : > { %v8160_v36 = vadd.f32 %v1221_v35, %v771_v30  ;;  %v6535_v37 = vpop.f32.mrb[11].mxu1 }
 0x166   : > { %v1631_v48 = vpop.f32.mrb[4].mxu0  ;;  %v1674_v49 = vpop.f32.mrb[4].mxu1 }
 0x167   : > { %v1769_v50 = vadd.f32 %v1747_v44, %v1631_v48  ;;  %v1771_v51 = vadd.f32 %v1755_v45, %v1674_v49  ;;  %v1633_v52 = vpop.f32.mrb[5].mxu0  ;;  %v1676_v53 = vpop.f32.mrb[5].mxu1 }
 0x168   : > { %v1770_v54 = vadd.f32 %v1751_v46, %v1633_v52  ;;  %v1772_v56 = vadd.f32 %v1759_v47, %v1676_v53  ;;  %v1635_v57 = vpop.f32.mrb[6].mxu0  ;;  %v1678_v58 = vpop.f32.mrb[6].mxu1 }
 0x169   : > { %v1779_v59 = vmax.f32 %v1769_v50, 0.0  ;;  %v1781_v60 = vmax.f32 %v1771_v51, 0.0  ;;  %v1774_v61 = vadd.f32 %v1747_v44, %v1635_v57  ;;  %v1776_v62 = vadd.f32 %v1755_v45, %v1678_v58  ;;  %v1637_v63 = vpop.f32.mrb[7].mxu0  ;;  %v1680_v0 = vpop.f32.mrb[7].mxu1 }
 0x16a   : > { %v1780_v1 = vmax.f32 %v1770_v54, 0.0  ;;  %v1782_v3 = vmax.f32 %v1772_v56, 0.0  ;;  %v1775_v4 = vadd.f32 %v1751_v46, %v1637_v63  ;;  %v1777_v5 = vadd.f32 %v1759_v47, %v1680_v0 }
 0x16b   : > { %v1809_v6 = vrot.slane %v1779_v59, 7  ;;  %v1811_v7 = vrot.slane %v1781_v60, 7  ;;  %v1784_v8 = vmax.f32 %v1774_v61, 0.0  ;;  %v1786_v9 = vmax.f32 %v1776_v62, 0.0 }
 0x16c   : > { %v1810_v10 = vrot.slane %v1780_v1, 7  ;;  %v1812_v11 = vrot.slane %v1782_v3, 7  ;;  %v1785_v12 = vmax.f32 %v1775_v4, 0.0  ;;  %v1787_v55 = vmax.f32 %v1777_v5, 0.0 }
 0x16d   : > { %1839 = vst [vmem:[#allocation2] sm:$0xfe] %v1809_v6  ;;  %1841 = vst [vmem:[#allocation2 + $0x10] sm:$0xfe] %v1811_v7  ;;  %v1814_v13 = vrot.slane %v1784_v8, 7  ;;  %v1818_v14 = vrot.slane %v1786_v9, 7 }
 0x16e   : > { %1840 = vst [vmem:[#allocation2 + $0x8] sm:$0xfe] %v1810_v10  ;;  %1842 = vst [vmem:[#allocation2 + $0x18] sm:$0xfe] %v1812_v11  ;;  %v1816_v15 = vrot.slane %v1785_v12, 7  ;;  %v1820_v16 = vrot.slane %v1787_v55, 7 }
 0x16f   : > { %v8180_v17 = vsel %vm1808_vm4, %v1809_v6, %v1814_v13  ;;  %1851 = vst [vmem:[#allocation2 + $0x50] sm:$0x1] %v1814_v13  ;;  %v8183_v18 = vsel %vm1808_vm4, %v1811_v7, %v1818_v14  ;;  %1853 = vst [vmem:[#allocation2 + $0x60] sm:$0x1] %v1818_v14  ;;  %v6897_v9 = vld [vmem:[%s9508_s2 + $0x680] ss:$16 sps:$4 sm:$0xff]  }
 0x170   : > { %1845 = vst [vmem:[#allocation2 + $0x28] sm:$0xff] %v8180_v17  ;;  %v8187_v19 = vsel %vm1808_vm4, %v1810_v10, %v1816_v15  ;;  %1852 = vst [vmem:[#allocation2 + $0x58] sm:$0x1] %v1816_v15  ;;  %v8190_v20 = vsel %vm1808_vm4, %v1812_v11, %v1820_v16  ;;  %v6902_v11 = vld [vmem:[%s9508_s2 + $0x6a4] ss:$16 sps:$4 sm:$0xff]  }
 0x171   : > { %1854 = vst [vmem:[#allocation2 + $0x68] sm:$0x1] %v1820_v16  ;;  %1846 = vst [vmem:[#allocation2 + $0x30] sm:$0xff] %v8187_v19 }
 0x174   : > { %v2016_v22 = vld [vmem:[#allocation2] sm:$0xfe]  ;;  %v2018_v23 = vld [vmem:[#allocation2 + $0x10] sm:$0xfe] }
 0x175   : > { %v2017_v24 = vld [vmem:[#allocation2 + $0x8] sm:$0xfe]  ;;  %v2026_v25 = vpack.c.bf16 %v8180_v17, %v2016_v22  ;;  %v2019_v26 = vld [vmem:[#allocation2 + $0x18] sm:$0xfe]  ;;  %v2028_v45 = vpack.c.bf16 %v8183_v18, %v2018_v23 }
 0x176   : > { %v2027_v28 = vpack.c.bf16 %v8187_v19, %v2017_v24  ;;  %v2021_v29 = vld [vmem:[#allocation2 + $0x50] sm:$0x1]  ;;  %v2029_v30 = vpack.c.bf16 %v8190_v20, %v2019_v26  ;;  %v2023_v31 = vld [vmem:[#allocation2 + $0x60] sm:$0x1]  ;;  %v6908_v26 = vld [vmem:[%s9508_s2 + $0x6c4] ss:$16 sps:$4 sm:$0xff]  }
 0x177   : > { %v2022_v32 = vld [vmem:[#allocation2 + $0x58] sm:$0x1]  ;;  %v2031_v34 = vpack.c.bf16 %v2021_v29, %v2021_v29  ;;  %v2183_v35 = vshrl.u32 %v2026_v25, 16  ;;  %v2185_v37 = vshll.u32 %v2026_v25, 16  ;;  %v2033_v49 = vpack.c.bf16 %v2023_v31, %v2023_v31  ;;  %v6900_v25 = vld [vmem:[%s9508_s2 + $0x6a0] ss:$16 sps:$4 sm:$0xff]  }
 0x178   : > { %v2024_v44 = vld [vmem:[#allocation2 + $0x68] sm:$0x1]  ;;  %v2032_v46 = vpack.c.bf16 %v2022_v32, %v2022_v32  ;;  %v2197_v47 = vshll.u32 %v2027_v28, 16  ;;  %v2195_v50 = vshrl.u32 %v2027_v28, 16  ;;  %v2221_v52 = vshll.u32 %v2029_v30, 16 }
 0x179   : > { %v2034_v48 = vpack.c.bf16 %v2024_v44, %v2024_v44  ;;  %v2187_v41 = vrot.slane %v2185_v37, 1  ;;  %v2190_v51 = vshll.u32 %v2031_v34, 16  ;;  %v2219_v57 = vshrl.u32 %v2029_v30, 16  ;;  %v4211_v29 = vld [vmem:[#allocation2 + $0x18] sm:$0xfc] }
 0x17a   : > { %v1717_v53 = vpop.f32.mrb[12].mxu0  ;;  %v2199_v54 = vrot.slane %v2197_v47, 1  ;;  %v2202_v56 = vshll.u32 %v2032_v46, 16  ;;  %v2223_v63 = vrot.slane %v2221_v52, 1  ;;  %v2209_v5 = vshll.u32 %v2028_v45, 16 }
 0x17b   : > { %v2226_v58 = vshll.u32 %v2034_v48, 16  ;;  %v1732_v59 = vadd.f32 %v1717_v53, %v8158_v33  ;;  %v6548_v60 = vpop.f32.mrb[13].mxu0  ;;  %v2188_v61 = vor.u32 %v2187_v41, %v2183_v35  ;;  %v2192_v62 = vrot.slane %v2190_v51, 1  ;;  %v4216_v30 = vld [vmem:[#allocation2 + $0x68] sm:$0x3] }
 0x17c   : > { %v1720_v0 = vpop.f32.mrb[14].mxu0  ;;  %v2200_v1 = vor.u32 %v2199_v54, %v2195_v50  ;;  %v2204_v3 = vrot.slane %v2202_v56, 1  ;;  %v2224_v10 = vor.u32 %v2223_v63, %v2219_v57  ;;  %v2207_v12 = vshrl.u32 %v2028_v45, 16  ;;  %v6906_v34 = vld [vmem:[%s9508_s2 + $0x6c0] ss:$16 sps:$4 sm:$0xff]  }
 0x17d   : > { %v2228_v4 = vrot.slane %v2226_v58, 1  ;;  %v1773_v6 = vadd.f32 %v1763_v27, %v1732_v59  ;;  %v1741_v7 = vadd.f32 %v1720_v0, %v8160_v36  ;;  %v6549_v8 = vpop.f32.mrb[15].mxu0  ;;  %v2211_v55 = vrot.slane %v2209_v5, 1  ;;  %v6914_v37 = vld [vmem:[%s9508_s2 + $0x6e4] ss:$16 sps:$4 sm:$0xff]  }
 0x17e   : > { %v8204_v33 = vsel %vm2181_vm5, %v2200_v1, %v2204_v3  ;;  %v2214_v13 = vshll.u32 %v2033_v49, 16  ;;  %v8211_v36 = vsel %vm2181_vm5, %v2188_v61, %v2192_v62  ;;  %v4221_v31 = vpack.c.bf16 %v8190_v20, %v4211_v29  ;;  %v4210_v44 = vld [vmem:[#allocation2 + $0x10] sm:$0xfc]  ;;  %v4215_v45 = vld [vmem:[#allocation2 + $0x60] sm:$0x3] }
 0x17f   : > { %v1783_v14 = vmax.f32 %v1773_v6, 0.0  ;;  %v1778_v15 = vadd.f32 %v1763_v27, %v1741_v7  ;;  %3001 = vmatprep.mubr.bf16.mxu0 %v8204_v33  ;;  %v8215_v16 = vsel %vm2181_vm5, %v2224_v10, %v2228_v4  ;;  %v2212_v21 = vor.u32 %v2211_v55, %v2207_v12  ;;  %v6912_v50 = vld [vmem:[%s9508_s2 + $0x6e0] ss:$16 sps:$4 sm:$0xff]   ;;  %v6920_v53 = vld [vmem:[%s9508_s2 + $0x704] ss:$16 sps:$4 sm:$0xff]  }
 0x180   : > { %3002 = vmatmul.mubr.bf16.vlgmr.msra.gmra.mrb[0].mxu0 %v8211_v36  ;;  %v2216_v22 = vrot.slane %v2214_v13, 1  ;;  %v4226_v35 = vpack.c.bf16 %v4216_v30, %v4216_v30  ;;  %v4393_v46 = vrot.slane %v4221_v31, 1  ;;  %v4220_v48 = vpack.c.bf16 %v8183_v18, %v4210_v44  ;;  %v6918_v56 = vld [vmem:[%s9508_s2 + $0x700] ss:$16 sps:$4 sm:$0xff]   ;;  %v6926_v62 = vld [vmem:[%s9508_s2 + $0x724] ss:$16 sps:$4 sm:$0xff]  }
 0x181   : > { %v1813_v23 = vrot.slane %v1783_v14, 7  ;;  %v1788_v24 = vmax.f32 %v1778_v15, 0.0  ;;  %3013 = vmatpush1.bf16.msra.mxu0 %v6897_v9  ;;  %3044 = vmatprep.mubr.bf16.mxu0 %v8215_v16  ;;  %v4225_v49 = vpack.c.bf16 %v4215_v45, %v4215_v45  ;;  %v6924_v6 = vld [vmem:[%s9508_s2 + $0x720] ss:$16 sps:$4 sm:$0xff]   ;;  %v6932_v10 = vld [vmem:[%s9508_s2 + $0x744] ss:$16 sps:$4 sm:$0xff]  }
 0x182   : > { %3014 = vmatprep.subr.bf16.mxu0 %v6902_v11  ;;  %v8225_v27 = vsel %vm2181_vm5, %v2212_v21, %v2216_v22  ;;  %v4394_v47 = vrot.slane %v4226_v35, 1  ;;  %v4390_v51 = vrot.slane %v4220_v48, 1  ;;  %v6927_v12 = vld [vmem:[%s9508_s2 + $0x488] ss:$16 sps:$4 sm:$0xff]   ;;  %v6930_v15 = vld [vmem:[%s9508_s2 + $0x740] ss:$16 sps:$4 sm:$0xff]  }
 0x183   : > { %1844 = vst.msk [vmem:[#allocation2 + $0x20] sm:$0xfe] %vm1843_vm6, %v1813_v23  ;;  %v1822_v28 = vrot.slane %v1788_v24, 7  ;;  %v4391_v52 = vrot.slane %v4225_v49, 1  ;;  %v6935_v21 = vld [vmem:[%s9508_s2 + $0x4ac] ss:$16 sps:$4 sm:$0xff]  }
 0x184   : > { %v8241_v41 = vsel %vm4383_vm9, %v4393_v46, %v4394_v47  ;;  %v6933_v24 = vld [vmem:[%s9508_s2 + $0x4a8] ss:$16 sps:$4 sm:$0xff]   ;;  %v6942_v29 = vld [vmem:[%s9508_s2 + $0x780] ss:$16 sps:$4 sm:$0xff]   ;;  %v6947_v30 = vld [vmem:[%s9508_s2 + $0x4ec] ss:$16 sps:$4 sm:$0xff]  }
 0x185   : > { %v1823_v32 = vsel %vm1808_vm4, %v1813_v23, %v1822_v28  ;;  %1856 = vst.msk [vmem:[#allocation2 + $0x70] sm:$0x1] %vm1855_vm7, %v1822_v28  ;;  %3015 = vmatpush1.bf16.msra.mxu0 %v6900_v25  ;;  %v8247_v54 = vsel %vm4383_vm9, %v4390_v51, %v4391_v52  ;;  %v6938_v23 = vld [vmem:[%s9508_s2 + $0x764] ss:$16 sps:$4 sm:$0xff]   ;;  %v6936_v25 = vld [vmem:[%s9508_s2 + $0x760] ss:$16 sps:$4 sm:$0xff]  }
 0x186   : > { %1850 = vst.msk [vmem:[#allocation2 + $0x48] sm:$0xff] %vm1849_vm8, %v1823_v32  ;;  %3016 = vmatprep.subr.bf16.mxu0 %v6908_v26  ;;  %v6941_v26 = vld [vmem:[%s9508_s2 + $0x4cc] ss:$16 sps:$4 sm:$0xff]   ;;  %v6944_v28 = vld [vmem:[%s9508_s2 + $0x784] ss:$16 sps:$4 sm:$0xff]  }
 0x187   : > { %v6950_v31 = vld [vmem:[%s9508_s2 + $0x7a4] ss:$16 sps:$4 sm:$0xff]   ;;  %v6945_v32 = vld [vmem:[%s9508_s2 + $0x4e8] ss:$16 sps:$4 sm:$0xff]   ;;  %v6953_v35 = vld [vmem:[%s9508_s2 + $0x50c] ss:$16 sps:$4 sm:$0xff]  }
 0x188   : > { %v6951_v44 = vld [vmem:[%s9508_s2 + $0x508] ss:$16 sps:$4 sm:$0xff]   ;;  %v6954_v45 = vld [vmem:[%s9508_s2 + $0x7c0] ss:$16 sps:$4 sm:$0xff]   ;;  %v6959_v46 = vld [vmem:[%s9508_s2 + $0x52c] ss:$16 sps:$4 sm:$0xff]  }
 0x189   : > { %3017 = vmatpush1.bf16.msra.mxu0 %v6906_v34  ;;  %v6948_v34 = vld [vmem:[%s9508_s2 + $0x7a0] ss:$16 sps:$4 sm:$0xff]   ;;  %v6962_v47 = vld [vmem:[%s9508_s2 + $0x7e4] ss:$16 sps:$4 sm:$0xff]   ;;  %v6957_v48 = vld [vmem:[%s9508_s2 + $0x528] ss:$16 sps:$4 sm:$0xff]  }
 0x18a   : > { %3018 = vmatprep.subr.bf16.mxu0 %v6914_v37  ;;  %v2020_v59 = vld [vmem:[#allocation2 + $0x20] sm:$0xfe]  ;;  %v6963_v52 = vld [vmem:[%s9508_s2 + $0x548] ss:$16 sps:$4 sm:$0xff]  }
 0x18b   : > { %v4212_v61 = vld [vmem:[#allocation2 + $0x20] sm:$0xfc] }
 0x18c   : > { %v2025_v57 = vld [vmem:[#allocation2 + $0x70] sm:$0x1]  ;;  %v6956_v37 = vld [vmem:[%s9508_s2 + $0x7c4] ss:$16 sps:$4 sm:$0xff]  }
 0x18d   : > { %3019 = vmatpush1.bf16.msra.mxu0 %v6912_v50  ;;  %v8252_v58 = vld [vmem:[#allocation2 + $0x48] sm:$0xff]  ;;  %v2035_v60 = vpack.c.bf16 %v2025_v57, %v2025_v57  ;;  %v4217_v0 = vld [vmem:[#allocation2 + $0x70] sm:$0x3]  ;;  %v6968_v51 = vld [vmem:[%s9508_s2 + $0x804] ss:$16 sps:$4 sm:$0xff]  }
 0x18e   : > { %3020 = vmatprep.subr.bf16.mxu0 %v6920_v53  ;;  %v2030_v63 = vpack.c.bf16 %v8252_v58, %v2020_v59  ;;  %v4222_v1 = vpack.c.bf16 %v8252_v58, %v4212_v61  ;;  %v4227_v3 = vpack.c.bf16 %v4217_v0, %v4217_v0  ;;  %v6960_v49 = vld [vmem:[%s9508_s2 + $0x7e0] ss:$16 sps:$4 sm:$0xff]   ;;  %v6965_v50 = vld [vmem:[%s9508_s2 + $0x54c] ss:$16 sps:$4 sm:$0xff]   ;;  %v6974_v57 = vld [vmem:[%s9508_s2 + $0x824] ss:$16 sps:$4 sm:$0xff]  }
 0x18f   : > { %v2238_v5 = vshll.u32 %v2035_v60, 16  ;;  %v6966_v53 = vld [vmem:[%s9508_s2 + $0x800] ss:$16 sps:$4 sm:$0xff]   ;;  %v6969_v59 = vld [vmem:[%s9508_s2 + $0x568] ss:$16 sps:$4 sm:$0xff]  }
 0x190   : > { %v2233_v4 = vshll.u32 %v2030_v63, 16  ;;  %v4396_v7 = vrot.slane %v4222_v1, 1  ;;  %v2231_v8 = vshrl.u32 %v2030_v63, 16  ;;  %v4397_v11 = vrot.slane %v4227_v3, 1  ;;  %v6972_v60 = vld [vmem:[%s9508_s2 + $0x820] ss:$16 sps:$4 sm:$0xff]  }
 0x191   : > { %3021 = vmatpush1.bf16.msra.mxu0 %v6918_v56  ;;  %v2240_v13 = vrot.slane %v2238_v5, 1  ;;  %v6971_v56 = vld [vmem:[%s9508_s2 + $0x56c] ss:$16 sps:$4 sm:$0xff]   ;;  %v6975_v63 = vld [vmem:[%s9508_s2 + $0x588] ss:$16 sps:$4 sm:$0xff]  }
 0x192   : > { %3022 = vmatprep.subr.bf16.mxu0 %v6926_v62  ;;  %v2235_v9 = vrot.slane %v2233_v4, 1  ;;  %v8269_v14 = vsel %vm4383_vm9, %v4396_v7, %v4397_v11  ;;  %v6977_v61 = vld [vmem:[%s9508_s2 + $0x58c] ss:$16 sps:$4 sm:$0xff]   ;;  %v6980_v62 = vld [vmem:[%s9508_s2 + $0x844] ss:$16 sps:$4 sm:$0xff]  }
 0x193   : > { %v6978_v0 = vld [vmem:[%s9508_s2 + $0x840] ss:$16 sps:$4 sm:$0xff]   ;;  %v6983_v1 = vld [vmem:[%s9508_s2 + $0x5ac] ss:$16 sps:$4 sm:$0xff]   ;;  %v6986_v3 = vld [vmem:[%s9508_s2 + $0x864] ss:$16 sps:$4 sm:$0xff]  }
 0x194   : > { %v2236_v55 = vor.u32 %v2235_v9, %v2231_v8  ;;  %v6981_v4 = vld [vmem:[%s9508_s2 + $0x5a8] ss:$16 sps:$4 sm:$0xff]   ;;  %v6984_v5 = vld [vmem:[%s9508_s2 + $0x860] ss:$16 sps:$4 sm:$0xff]   ;;  %v6995_v7 = vld [vmem:[%s9508_s2 + $0x4] ss:$16 sps:$4 sm:$0xff]  }
 0x195   : > { %3023 = vmatpush1.bf16.msra.mxu0 %v6924_v6  ;;  %v6989_v6 = vld [vmem:[%s9508_s2 + $0x5cc] ss:$16 sps:$4 sm:$0xff]   ;;  %v6987_v8 = vld [vmem:[%s9508_s2 + $0x5c8] ss:$16 sps:$4 sm:$0xff]  }
 0x196   : > { %v8278_v22 = vsel %vm2181_vm5, %v2236_v55, %v2240_v13  ;;  %3024 = vmatprep.subr.bf16.mxu0 %v6932_v10  ;;  %v6992_v9 = vld [vmem:[%s9508_s2 + $0x5ec] ss:$16 sps:$4 sm:$0xff]   ;;  %v6993_v10 = vld [vmem:[%s9508_s2] ss:$16 sps:$4 sm:$0xff]   ;;  %v6990_v55 = vld [vmem:[%s9508_s2 + $0x5e8] ss:$16 sps:$4 sm:$0xff]  }
 0x197   : > { %6049 = vmatmul.mubr.msk.bf16.vlgmr.msra.gmra.mrb[12].mxu1 %vm1849_vm8, %v8278_v22  ;;  %v1858_v11 = vld [vmem:[#allocation2 + $0x8] sm:$0xff] }
 0x198   : > { %3099 = vmatpush1.bf16.msra.mxu1 %v6927_v12  ;;  %3130 = vmatprep.mubr.bf16.mxu1 %v8204_v33  ;;  %v6939_v33 = vld [vmem:[%s9508_s2 + $0x4c8] ss:$16 sps:$4 sm:$0xff]   ;;  %v7001_v12 = vld [vmem:[%s9508_s2 + $0x24] ss:$16 sps:$4 sm:$0xff]   ;;  %v8411_v13 = vpack.c.bf16 %v8187_v19, %v1858_v11  ;;  %v7065_v11 = vld [vmem:[%s9508_s2 + $0x180] ss:$16 sps:$4 sm:$0xff]  }
 0x199   : > { %3100 = vmatprep.subr.bf16.mxu1 %v6935_v21  ;;  %3025 = vmatpush1.bf16.msra.mxu0 %v6930_v15  ;;  %v6998_v15 = vld [vmem:[%s9508_s2 + $0x60c] ss:$16 sps:$4 sm:$0xff]   ;;  %v6999_v21 = vld [vmem:[%s9508_s2 + $0x20] ss:$16 sps:$4 sm:$0xff]   ;;  %v6996_v19 = vld [vmem:[%s9508_s2 + $0x608] ss:$16 sps:$4 sm:$0xff]  }
 0x19a   : > { %3026 = vmatprep.subr.bf16.mxu0 %v6938_v23  ;;  %v7007_v23 = vld [vmem:[%s9508_s2 + $0x44] ss:$16 sps:$4 sm:$0xff]  }
 0x19c   : > { %3101 = vmatpush1.bf16.msra.mxu1 %v6933_v24  ;;  %v7004_v24 = vld [vmem:[%s9508_s2 + $0x62c] ss:$16 sps:$4 sm:$0xff]  }
 0x19d   : > { %3102 = vmatprep.subr.bf16.mxu1 %v6941_v26  ;;  %3027 = vmatpush1.bf16.msra.mxu0 %v6936_v25  ;;  %v7005_v25 = vld [vmem:[%s9508_s2 + $0x40] ss:$16 sps:$4 sm:$0xff]   ;;  %v7013_v26 = vld [vmem:[%s9508_s2 + $0x64] ss:$16 sps:$4 sm:$0xff]  }
 0x19e   : > { %3028 = vmatprep.subr.bf16.mxu0 %v6944_v28  ;;  %v7002_v28 = vld [vmem:[%s9508_s2 + $0x628] ss:$16 sps:$4 sm:$0xff]  }
 0x1a0   : > { %3103 = vmatpush1.bf16.msra.mxu1 %v6939_v33  ;;  %v7010_v33 = vld [vmem:[%s9508_s2 + $0x64c] ss:$16 sps:$4 sm:$0xff]  }
 0x1a1   : > { %3104 = vmatprep.subr.bf16.mxu1 %v6947_v30  ;;  %3029 = vmatpush1.bf16.msra.mxu0 %v6942_v29  ;;  %v7011_v29 = vld [vmem:[%s9508_s2 + $0x60] ss:$16 sps:$4 sm:$0xff]   ;;  %v7019_v30 = vld [vmem:[%s9508_s2 + $0x84] ss:$16 sps:$4 sm:$0xff]  }
 0x1a2   : > { %3030 = vmatprep.subr.bf16.mxu0 %v6950_v31  ;;  %v7008_v31 = vld [vmem:[%s9508_s2 + $0x648] ss:$16 sps:$4 sm:$0xff]  }
 0x1a4   : > { %3105 = vmatpush1.bf16.msra.mxu1 %v6945_v32  ;;  %v7016_v32 = vld [vmem:[%s9508_s2 + $0x66c] ss:$16 sps:$4 sm:$0xff]  }
 0x1a5   : > { %3106 = vmatprep.subr.bf16.mxu1 %v6953_v35  ;;  %3031 = vmatpush1.bf16.msra.mxu0 %v6948_v34  ;;  %v7017_v34 = vld [vmem:[%s9508_s2 + $0x80] ss:$16 sps:$4 sm:$0xff]   ;;  %v7025_v35 = vld [vmem:[%s9508_s2 + $0xa4] ss:$16 sps:$4 sm:$0xff]  }
 0x1a6   : > { %3032 = vmatprep.subr.bf16.mxu0 %v6956_v37  ;;  %v7014_v37 = vld [vmem:[%s9508_s2 + $0x668] ss:$16 sps:$4 sm:$0xff]  }
 0x1a8   : > { %3107 = vmatpush1.bf16.msra.mxu1 %v6951_v44  ;;  %v7022_v44 = vld [vmem:[%s9508_s2 + $0x68c] ss:$16 sps:$4 sm:$0xff]  }
 0x1a9   : > { %3108 = vmatprep.subr.bf16.mxu1 %v6959_v46  ;;  %3033 = vmatpush1.bf16.msra.mxu0 %v6954_v45  ;;  %v7023_v45 = vld [vmem:[%s9508_s2 + $0xa0] ss:$16 sps:$4 sm:$0xff]   ;;  %v7031_v46 = vld [vmem:[%s9508_s2 + $0xc4] ss:$16 sps:$4 sm:$0xff]  }
 0x1aa   : > { %3034 = vmatprep.subr.bf16.mxu0 %v6962_v47  ;;  %v7020_v47 = vld [vmem:[%s9508_s2 + $0x688] ss:$16 sps:$4 sm:$0xff]  }
 0x1ac   : > { %3109 = vmatpush1.bf16.msra.mxu1 %v6957_v48  ;;  %v7028_v48 = vld [vmem:[%s9508_s2 + $0x6ac] ss:$16 sps:$4 sm:$0xff]  }
 0x1ad   : > { %3110 = vmatprep.subr.bf16.mxu1 %v6965_v50  ;;  %3035 = vmatpush1.bf16.msra.mxu0 %v6960_v49  ;;  %v7029_v49 = vld [vmem:[%s9508_s2 + $0xc0] ss:$16 sps:$4 sm:$0xff]   ;;  %v7037_v50 = vld [vmem:[%s9508_s2 + $0xe4] ss:$16 sps:$4 sm:$0xff]  }
 0x1ae   : > { %3036 = vmatprep.subr.bf16.mxu0 %v6968_v51  ;;  %v7026_v51 = vld [vmem:[%s9508_s2 + $0x6a8] ss:$16 sps:$4 sm:$0xff]  }
 0x1b0   : > { %3111 = vmatpush1.bf16.msra.mxu1 %v6963_v52  ;;  %v7034_v52 = vld [vmem:[%s9508_s2 + $0x6cc] ss:$16 sps:$4 sm:$0xff]  }
 0x1b1   : > { %3112 = vmatprep.subr.bf16.mxu1 %v6971_v56  ;;  %3037 = vmatpush1.bf16.msra.mxu0 %v6966_v53  ;;  %v7035_v53 = vld [vmem:[%s9508_s2 + $0xe0] ss:$16 sps:$4 sm:$0xff]   ;;  %v7040_v56 = vld [vmem:[%s9508_s2 + $0x6ec] ss:$16 sps:$4 sm:$0xff]  }
 0x1b2   : > { %3038 = vmatprep.subr.bf16.mxu0 %v6974_v57  ;;  %v7041_v57 = vld [vmem:[%s9508_s2 + $0x100] ss:$16 sps:$4 sm:$0xff]  }
 0x1b4   : > { %3113 = vmatpush1.bf16.msra.mxu1 %v6969_v59  ;;  %v7049_v59 = vld [vmem:[%s9508_s2 + $0x124] ss:$16 sps:$4 sm:$0xff]  }
 0x1b5   : > { %3114 = vmatprep.subr.bf16.mxu1 %v6977_v61  ;;  %3039 = vmatpush1.bf16.msra.mxu0 %v6972_v60  ;;  %v7038_v60 = vld [vmem:[%s9508_s2 + $0x6e8] ss:$16 sps:$4 sm:$0xff]   ;;  %v7046_v61 = vld [vmem:[%s9508_s2 + $0x70c] ss:$16 sps:$4 sm:$0xff]  }
 0x1b6   : > { %3040 = vmatprep.subr.bf16.mxu0 %v6980_v62  ;;  %v7047_v62 = vld [vmem:[%s9508_s2 + $0x120] ss:$16 sps:$4 sm:$0xff]  }
 0x1b8   : > { %3115 = vmatpush1.bf16.msra.mxu1 %v6975_v63  ;;  %v7055_v63 = vld [vmem:[%s9508_s2 + $0x144] ss:$16 sps:$4 sm:$0xff]  }
 0x1b9   : > { %3116 = vmatprep.subr.bf16.mxu1 %v6983_v1  ;;  %3041 = vmatpush1.bf16.msra.mxu0 %v6978_v0  ;;  %v7044_v0 = vld [vmem:[%s9508_s2 + $0x708] ss:$16 sps:$4 sm:$0xff]   ;;  %v7052_v1 = vld [vmem:[%s9508_s2 + $0x72c] ss:$16 sps:$4 sm:$0xff]  }
 0x1ba   : > { %3042 = vmatprep.subr.bf16.mxu0 %v6986_v3  ;;  %v7053_v3 = vld [vmem:[%s9508_s2 + $0x140] ss:$16 sps:$4 sm:$0xff]  }
 0x1bc   : > { %3117 = vmatpush1.bf16.msra.mxu1 %v6981_v4  ;;  %v7061_v4 = vld [vmem:[%s9508_s2 + $0x164] ss:$16 sps:$4 sm:$0xff]  }
 0x1bd   : > { %3118 = vmatprep.subr.bf16.mxu1 %v6989_v6  ;;  %3043 = vmatpush1.bf16.msra.mxu0 %v6984_v5  ;;  %v7050_v5 = vld [vmem:[%s9508_s2 + $0x728] ss:$16 sps:$4 sm:$0xff]   ;;  %v7058_v6 = vld [vmem:[%s9508_s2 + $0x74c] ss:$16 sps:$4 sm:$0xff]  }
 0x1be   : > { %3950 = vmatprep.subr.bf16.mxu0 %v6995_v7  ;;  %v7059_v7 = vld [vmem:[%s9508_s2 + $0x160] ss:$16 sps:$4 sm:$0xff]  }
 0x1c0   : > { %3119 = vmatpush1.bf16.msra.mxu1 %v6987_v8  ;;  %3045 = vmatmul.mubr.bf16.vlgmr.msra.gmra.mrb[0].mxu0 %v8225_v27  ;;  %v7067_v8 = vld [vmem:[%s9508_s2 + $0x184] ss:$16 sps:$4 sm:$0xff]  }
 0x1c1   : > { %3120 = vmatprep.subr.bf16.mxu1 %v6992_v9  ;;  %3951 = vmatpush1.bf16.msra.mxu0 %v6993_v10  ;;  %v7056_v9 = vld [vmem:[%s9508_s2 + $0x748] ss:$16 sps:$4 sm:$0xff]   ;;  %v7064_v10 = vld [vmem:[%s9508_s2 + $0x76c] ss:$16 sps:$4 sm:$0xff]  }
 0x1c2   : > { %3982 = vmatprep.mubr.bf16.mxu0 %v8411_v13  ;;  %3952 = vmatprep.subr.bf16.mxu0 %v7001_v12  ;;  %v7073_v12 = vld [vmem:[%s9508_s2 + $0x1a4] ss:$16 sps:$4 sm:$0xff]  }
 0x1c4   : > { %3121 = vmatpush1.bf16.msra.mxu1 %v6990_v55  ;;  %v7062_v55 = vld [vmem:[%s9508_s2 + $0x768] ss:$16 sps:$4 sm:$0xff]  }
 0x1c5   : > { %3122 = vmatprep.subr.bf16.mxu1 %v6998_v15  ;;  %3953 = vmatpush1.bf16.msra.mxu0 %v6999_v21  ;;  %v7070_v15 = vld [vmem:[%s9508_s2 + $0x78c] ss:$16 sps:$4 sm:$0xff]   ;;  %v7071_v21 = vld [vmem:[%s9508_s2 + $0x1a0] ss:$16 sps:$4 sm:$0xff]  }
 0x1c6   : > { %3954 = vmatprep.subr.bf16.mxu0 %v7007_v23  ;;  %v7079_v23 = vld [vmem:[%s9508_s2 + $0x1c4] ss:$16 sps:$4 sm:$0xff]  }
 0x1c8   : > { %3123 = vmatpush1.bf16.msra.mxu1 %v6996_v19  ;;  %v7068_v19 = vld [vmem:[%s9508_s2 + $0x788] ss:$16 sps:$4 sm:$0xff]  }
 0x1c9   : > { %3124 = vmatprep.subr.bf16.mxu1 %v7004_v24  ;;  %3955 = vmatpush1.bf16.msra.mxu0 %v7005_v25  ;;  %v7076_v24 = vld [vmem:[%s9508_s2 + $0x7ac] ss:$16 sps:$4 sm:$0xff]   ;;  %v7077_v25 = vld [vmem:[%s9508_s2 + $0x1c0] ss:$16 sps:$4 sm:$0xff]  }
 0x1ca   : > { %3956 = vmatprep.subr.bf16.mxu0 %v7013_v26  ;;  %v7085_v26 = vld [vmem:[%s9508_s2 + $0x1e4] ss:$16 sps:$4 sm:$0xff]  }
 0x1cc   : > { %3125 = vmatpush1.bf16.msra.mxu1 %v7002_v28  ;;  %v7074_v28 = vld [vmem:[%s9508_s2 + $0x7a8] ss:$16 sps:$4 sm:$0xff]  }
 0x1cd   : > { %3126 = vmatprep.subr.bf16.mxu1 %v7010_v33  ;;  %3957 = vmatpush1.bf16.msra.mxu0 %v7011_v29  ;;  %v7082_v33 = vld [vmem:[%s9508_s2 + $0x7cc] ss:$16 sps:$4 sm:$0xff]   ;;  %v7083_v29 = vld [vmem:[%s9508_s2 + $0x1e0] ss:$16 sps:$4 sm:$0xff]  }
 0x1ce   : > { %3958 = vmatprep.subr.bf16.mxu0 %v7019_v30  ;;  %v7091_v30 = vld [vmem:[%s9508_s2 + $0x204] ss:$16 sps:$4 sm:$0xff]  }
 0x1d0   : > { %3127 = vmatpush1.bf16.msra.mxu1 %v7008_v31  ;;  %v1857_v31 = vld [vmem:[#allocation2] sm:$0xff] }
 0x1d1   : > { %3128 = vmatprep.subr.bf16.mxu1 %v7016_v32  ;;  %3959 = vmatpush1.bf16.msra.mxu0 %v7017_v34  ;;  %v7080_v32 = vld [vmem:[%s9508_s2 + $0x7c8] ss:$16 sps:$4 sm:$0xff]   ;;  %v7088_v34 = vld [vmem:[%s9508_s2 + $0x7ec] ss:$16 sps:$4 sm:$0xff]  }
 0x1d2   : > { %3960 = vmatprep.subr.bf16.mxu0 %v7025_v35  ;;  %v7089_v35 = vld [vmem:[%s9508_s2 + $0x200] ss:$16 sps:$4 sm:$0xff]  }
 0x1d4   : > { %3129 = vmatpush1.bf16.msra.mxu1 %v7014_v37  ;;  %v1860_v37 = vld [vmem:[#allocation2 + $0x18] sm:$0xff] }
 0x1d5   : > { %3141 = vmatprep.subr.bf16.mxu1 %v7022_v44  ;;  %3961 = vmatpush1.bf16.msra.mxu0 %v7023_v45  ;;  %v8603_v44 = vpack.c.bf16 %v8180_v17, %v1857_v31  ;;  %v7097_v45 = vld [vmem:[%s9508_s2 + $0x224] ss:$16 sps:$4 sm:$0xff]   ;;  %v7094_v17 = vld [vmem:[%s9508_s2 + $0x80c] ss:$16 sps:$4 sm:$0xff]   ;;  %v7158_v31 = vld [vmem:[%s9508_s2 + $0x380] ss:$16 sps:$4 sm:$0xff]  }
 0x1d6   : > { %3962 = vmatprep.subr.bf16.mxu0 %v7031_v46  ;;  %v7086_v46 = vld [vmem:[%s9508_s2 + $0x7e8] ss:$16 sps:$4 sm:$0xff]  }
 0x1d7   : > { %3131 = vmatmul.mubr.bf16.vlgmr.msra.gmra.mrb[0].mxu1 %v8211_v36  ;;  %v7043_v36 = vld [vmem:[%s9508_s2 + $0x104] ss:$16 sps:$4 sm:$0xff]  }
 0x1d8   : > { %3142 = vmatpush1.bf16.msra.mxu1 %v7020_v47  ;;  %3173 = vmatprep.mubr.bf16.mxu1 %v8215_v16  ;;  %v7032_v16 = vld [vmem:[%s9508_s2 + $0x6c8] ss:$16 sps:$4 sm:$0xff]   ;;  %v8613_v47 = vpack.c.bf16 %v8190_v20, %v1860_v37  ;;  %v7164_v37 = vld [vmem:[%s9508_s2 + $0x3a0] ss:$16 sps:$4 sm:$0xff]  }
 0x1d9   : > { %3143 = vmatprep.subr.bf16.mxu1 %v7028_v48  ;;  %3963 = vmatpush1.bf16.msra.mxu0 %v7029_v49  ;;  %v7095_v48 = vld [vmem:[%s9508_s2 + $0x220] ss:$16 sps:$4 sm:$0xff]   ;;  %v7103_v49 = vld [vmem:[%s9508_s2 + $0x244] ss:$16 sps:$4 sm:$0xff]   ;;  %v7092_v20 = vld [vmem:[%s9508_s2 + $0x808] ss:$16 sps:$4 sm:$0xff]  }
 0x1da   : > { %3964 = vmatprep.subr.bf16.mxu0 %v7037_v50  ;;  %v7100_v50 = vld [vmem:[%s9508_s2 + $0x82c] ss:$16 sps:$4 sm:$0xff]  }
 0x1dc   : > { %3144 = vmatpush1.bf16.msra.mxu1 %v7026_v51  ;;  %v7101_v51 = vld [vmem:[%s9508_s2 + $0x240] ss:$16 sps:$4 sm:$0xff]  }
 0x1dd   : > { %3145 = vmatprep.subr.bf16.mxu1 %v7034_v52  ;;  %3965 = vmatpush1.bf16.msra.mxu0 %v7035_v53  ;;  %v7109_v52 = vld [vmem:[%s9508_s2 + $0x264] ss:$16 sps:$4 sm:$0xff]   ;;  %v7098_v53 = vld [vmem:[%s9508_s2 + $0x828] ss:$16 sps:$4 sm:$0xff]  }
 0x1de   : > { %3966 = vmatprep.subr.bf16.mxu0 %v7043_v36  ;;  %v7106_v36 = vld [vmem:[%s9508_s2 + $0x84c] ss:$16 sps:$4 sm:$0xff]  }
 0x1e0   : > { %3146 = vmatpush1.bf16.msra.mxu1 %v7032_v16  ;;  %v7107_v16 = vld [vmem:[%s9508_s2 + $0x260] ss:$16 sps:$4 sm:$0xff]  }
 0x1e1   : > { %3147 = vmatprep.subr.bf16.mxu1 %v7040_v56  ;;  %3967 = vmatpush1.bf16.msra.mxu0 %v7041_v57  ;;  %v7115_v56 = vld [vmem:[%s9508_s2 + $0x284] ss:$16 sps:$4 sm:$0xff]   ;;  %v7104_v57 = vld [vmem:[%s9508_s2 + $0x848] ss:$16 sps:$4 sm:$0xff]  }
 0x1e2   : > { %3968 = vmatprep.subr.bf16.mxu0 %v7049_v59  ;;  %v7112_v59 = vld [vmem:[%s9508_s2 + $0x86c] ss:$16 sps:$4 sm:$0xff]  }
 0x1e4   : > { %3148 = vmatpush1.bf16.msra.mxu1 %v7038_v60  ;;  %v7113_v60 = vld [vmem:[%s9508_s2 + $0x280] ss:$16 sps:$4 sm:$0xff]  }
 0x1e5   : > { %3149 = vmatprep.subr.bf16.mxu1 %v7046_v61  ;;  %3969 = vmatpush1.bf16.msra.mxu0 %v7047_v62  ;;  %v7121_v61 = vld [vmem:[%s9508_s2 + $0x2a4] ss:$16 sps:$4 sm:$0xff]   ;;  %v7110_v62 = vld [vmem:[%s9508_s2 + $0x868] ss:$16 sps:$4 sm:$0xff]  }
 0x1e6   : > { %3970 = vmatprep.subr.bf16.mxu0 %v7055_v63  ;;  %v7118_v63 = vld [vmem:[%s9508_s2 + $0x88c] ss:$16 sps:$4 sm:$0xff]  }
 0x1e8   : > { %3150 = vmatpush1.bf16.msra.mxu1 %v7044_v0  ;;  %v7119_v0 = vld [vmem:[%s9508_s2 + $0x2a0] ss:$16 sps:$4 sm:$0xff]  }
 0x1e9   : > { %3151 = vmatprep.subr.bf16.mxu1 %v7052_v1  ;;  %3971 = vmatpush1.bf16.msra.mxu0 %v7053_v3  ;;  %v7127_v1 = vld [vmem:[%s9508_s2 + $0x2c4] ss:$16 sps:$4 sm:$0xff]   ;;  %v7116_v3 = vld [vmem:[%s9508_s2 + $0x888] ss:$16 sps:$4 sm:$0xff]  }
 0x1ea   : > { %3972 = vmatprep.subr.bf16.mxu0 %v7061_v4  ;;  %v7124_v4 = vld [vmem:[%s9508_s2 + $0x8ac] ss:$16 sps:$4 sm:$0xff]  }
 0x1ec   : > { %3152 = vmatpush1.bf16.msra.mxu1 %v7050_v5  ;;  %v7125_v5 = vld [vmem:[%s9508_s2 + $0x2c0] ss:$16 sps:$4 sm:$0xff]  }
 0x1ed   : > { %3153 = vmatprep.subr.bf16.mxu1 %v7058_v6  ;;  %3973 = vmatpush1.bf16.msra.mxu0 %v7059_v7  ;;  %v7133_v6 = vld [vmem:[%s9508_s2 + $0x2e4] ss:$16 sps:$4 sm:$0xff]   ;;  %v7122_v7 = vld [vmem:[%s9508_s2 + $0x8a8] ss:$16 sps:$4 sm:$0xff]  }
 0x1ee   : > { %3974 = vmatprep.subr.bf16.mxu0 %v7067_v8  ;;  %v7130_v8 = vld [vmem:[%s9508_s2 + $0x8cc] ss:$16 sps:$4 sm:$0xff]  }
 0x1f0   : > { %3154 = vmatpush1.bf16.msra.mxu1 %v7056_v9  ;;  %v7131_v9 = vld [vmem:[%s9508_s2 + $0x2e0] ss:$16 sps:$4 sm:$0xff]  }
 0x1f1   : > { %3155 = vmatprep.subr.bf16.mxu1 %v7064_v10  ;;  %3975 = vmatpush1.bf16.msra.mxu0 %v7065_v11  ;;  %v7128_v10 = vld [vmem:[%s9508_s2 + $0x8c8] ss:$16 sps:$4 sm:$0xff]   ;;  %v7136_v11 = vld [vmem:[%s9508_s2 + $0x8ec] ss:$16 sps:$4 sm:$0xff]  }
 0x1f2   : > { %3976 = vmatprep.subr.bf16.mxu0 %v7073_v12  ;;  %v7137_v12 = vld [vmem:[%s9508_s2 + $0x300] ss:$16 sps:$4 sm:$0xff]  }
 0x1f4   : > { %3156 = vmatpush1.bf16.msra.mxu1 %v7062_v55  ;;  %v7142_v55 = vld [vmem:[%s9508_s2 + $0x324] ss:$16 sps:$4 sm:$0xff]  }
 0x1f5   : > { %3157 = vmatprep.subr.bf16.mxu1 %v7070_v15  ;;  %3977 = vmatpush1.bf16.msra.mxu0 %v7071_v21  ;;  %v7134_v15 = vld [vmem:[%s9508_s2 + $0x8e8] ss:$16 sps:$4 sm:$0xff]   ;;  %v7140_v21 = vld [vmem:[%s9508_s2 + $0x320] ss:$16 sps:$4 sm:$0xff]  }
 0x1f6   : > { %3978 = vmatprep.subr.bf16.mxu0 %v7079_v23  ;;  %v7145_v23 = vld [vmem:[%s9508_s2 + $0xc] ss:$16 sps:$4 sm:$0xff]  }
 0x1f8   : > { %3158 = vmatpush1.bf16.msra.mxu1 %v7068_v19  ;;  %v7148_v19 = vld [vmem:[%s9508_s2 + $0x344] ss:$16 sps:$4 sm:$0xff]  }
 0x1f9   : > { %3159 = vmatprep.subr.bf16.mxu1 %v7076_v24  ;;  %3979 = vmatpush1.bf16.msra.mxu0 %v7077_v25  ;;  %v7143_v24 = vld [vmem:[%s9508_s2 + $0x8] ss:$16 sps:$4 sm:$0xff]   ;;  %v7146_v25 = vld [vmem:[%s9508_s2 + $0x340] ss:$16 sps:$4 sm:$0xff]  }
 0x1fa   : > { %3980 = vmatprep.subr.bf16.mxu0 %v7085_v26  ;;  %v7151_v26 = vld [vmem:[%s9508_s2 + $0x2c] ss:$16 sps:$4 sm:$0xff]  }
 0x1fc   : > { %3160 = vmatpush1.bf16.msra.mxu1 %v7074_v28  ;;  %v7154_v28 = vld [vmem:[%s9508_s2 + $0x364] ss:$16 sps:$4 sm:$0xff]  }
 0x1fd   : > { %3161 = vmatprep.subr.bf16.mxu1 %v7082_v33  ;;  %3981 = vmatpush1.bf16.msra.mxu0 %v7083_v29  ;;  %v7149_v33 = vld [vmem:[%s9508_s2 + $0x28] ss:$16 sps:$4 sm:$0xff]   ;;  %v7152_v29 = vld [vmem:[%s9508_s2 + $0x360] ss:$16 sps:$4 sm:$0xff]  }
 0x1fe   : > { %3993 = vmatprep.subr.bf16.mxu0 %v7091_v30  ;;  %v7157_v30 = vld [vmem:[%s9508_s2 + $0x4c] ss:$16 sps:$4 sm:$0xff]  }
 0x200   : > { %3162 = vmatpush1.bf16.msra.mxu1 %v7080_v32  ;;  %3983 = vmatmul.mubr.bf16.vlgmr.msra.gmra.mrb[16].mxu0 %v8603_v44  ;;  %v7163_v32 = vld [vmem:[%s9508_s2 + $0x6c] ss:$16 sps:$4 sm:$0xff]  }
 0x201   : > { %3163 = vmatprep.subr.bf16.mxu1 %v7088_v34  ;;  %3994 = vmatpush1.bf16.msra.mxu0 %v7089_v35  ;;  %v7166_v34 = vld [vmem:[%s9508_s2 + $0x3a4] ss:$16 sps:$4 sm:$0xff]   ;;  %v7161_v35 = vld [vmem:[%s9508_s2 + $0x68] ss:$16 sps:$4 sm:$0xff]  }
 0x202   : > { %4025 = vmatprep.mubr.bf16.mxu0 %v8613_v47  ;;  %3995 = vmatprep.subr.bf16.mxu0 %v7097_v45  ;;  %v7169_v45 = vld [vmem:[%s9508_s2 + $0x8c] ss:$16 sps:$4 sm:$0xff]  }
 0x204   : > { %3164 = vmatpush1.bf16.msra.mxu1 %v7086_v46  ;;  %v7172_v46 = vld [vmem:[%s9508_s2 + $0x3c4] ss:$16 sps:$4 sm:$0xff]  }
 0x205   : > { %3165 = vmatprep.subr.bf16.mxu1 %v7094_v17  ;;  %3996 = vmatpush1.bf16.msra.mxu0 %v7095_v48  ;;  %v7167_v17 = vld [vmem:[%s9508_s2 + $0x88] ss:$16 sps:$4 sm:$0xff]   ;;  %v7170_v48 = vld [vmem:[%s9508_s2 + $0x3c0] ss:$16 sps:$4 sm:$0xff]  }
 0x206   : > { %3997 = vmatprep.subr.bf16.mxu0 %v7103_v49  ;;  %v7175_v49 = vld [vmem:[%s9508_s2 + $0xac] ss:$16 sps:$4 sm:$0xff]  }
 0x208   : > { %3166 = vmatpush1.bf16.msra.mxu1 %v7092_v20  ;;  %v7178_v20 = vld [vmem:[%s9508_s2 + $0x3e4] ss:$16 sps:$4 sm:$0xff]  }
 0x209   : > { %3167 = vmatprep.subr.bf16.mxu1 %v7100_v50  ;;  %3998 = vmatpush1.bf16.msra.mxu0 %v7101_v51  ;;  %v7173_v50 = vld [vmem:[%s9508_s2 + $0xa8] ss:$16 sps:$4 sm:$0xff]   ;;  %v7176_v51 = vld [vmem:[%s9508_s2 + $0x3e0] ss:$16 sps:$4 sm:$0xff]  }
 0x20a   : > { %3999 = vmatprep.subr.bf16.mxu0 %v7109_v52  ;;  %v7181_v52 = vld [vmem:[%s9508_s2 + $0xcc] ss:$16 sps:$4 sm:$0xff]  }
 0x20c   : > { %3168 = vmatpush1.bf16.msra.mxu1 %v7098_v53  ;;  %v7184_v53 = vld [vmem:[%s9508_s2 + $0x404] ss:$16 sps:$4 sm:$0xff]  }
 0x20d   : > { %3169 = vmatprep.subr.bf16.mxu1 %v7106_v36  ;;  %4000 = vmatpush1.bf16.msra.mxu0 %v7107_v16  ;;  %v1859_v36 = vld [vmem:[#allocation2 + $0x10] sm:$0xff]  ;;  %v7179_v16 = vld [vmem:[%s9508_s2 + $0xc8] ss:$16 sps:$4 sm:$0xff]  }
 0x20e   : > { %4001 = vmatprep.subr.bf16.mxu0 %v7115_v56  ;;  %v7182_v56 = vld [vmem:[%s9508_s2 + $0x400] ss:$16 sps:$4 sm:$0xff]  }
 0x210   : > { %3170 = vmatpush1.bf16.msra.mxu1 %v7104_v57  ;;  %v7187_v57 = vld [vmem:[%s9508_s2 + $0xec] ss:$16 sps:$4 sm:$0xff]  }
 0x211   : > { %3171 = vmatprep.subr.bf16.mxu1 %v7112_v59  ;;  %4002 = vmatpush1.bf16.msra.mxu0 %v7113_v60  ;;  %v8808_v59 = vpack.c.bf16 %v8183_v18, %v1859_v36  ;;  %v7190_v60 = vld [vmem:[%s9508_s2 + $0x424] ss:$16 sps:$4 sm:$0xff]   ;;  %v7193_v18 = vld [vmem:[%s9508_s2 + $0x10c] ss:$16 sps:$4 sm:$0xff]  }
 0x212   : > { %4003 = vmatprep.subr.bf16.mxu0 %v7121_v61  ;;  %v7185_v61 = vld [vmem:[%s9508_s2 + $0xe8] ss:$16 sps:$4 sm:$0xff]   ;;  %v7244_v36 = vld [vmem:[%s9508_s2 + $0x22c] ss:$16 sps:$4 sm:$0xff]  }
 0x214   : > { %3172 = vmatpush1.bf16.msra.mxu1 %v7110_v62  ;;  %v7188_v62 = vld [vmem:[%s9508_s2 + $0x420] ss:$16 sps:$4 sm:$0xff]  }
 0x215   : > { %3184 = vmatprep.subr.bf16.mxu1 %v7118_v63  ;;  %4004 = vmatpush1.bf16.msra.mxu0 %v7119_v0  ;;  %v7196_v63 = vld [vmem:[%s9508_s2 + $0x444] ss:$16 sps:$4 sm:$0xff]   ;;  %v7191_v0 = vld [vmem:[%s9508_s2 + $0x108] ss:$16 sps:$4 sm:$0xff]  }
 0x216   : > { %4005 = vmatprep.subr.bf16.mxu0 %v7127_v1  ;;  %v7194_v1 = vld [vmem:[%s9508_s2 + $0x440] ss:$16 sps:$4 sm:$0xff]  }
 0x217   : > { %3174 = vmatmul.mubr.bf16.vlgmr.msra.gmra.mrb[0].mxu1 %v8225_v27  ;;  %v7139_v27 = vld [vmem:[%s9508_s2 + $0x304] ss:$16 sps:$4 sm:$0xff]  }
 0x218   : > { %3185 = vmatpush1.bf16.msra.mxu1 %v7116_v3  ;;  %3216 = vmatprep.mubr.bf16.mxu1 %v7507_v2  ;;  %v7199_v3 = vld [vmem:[%s9508_s2 + $0x12c] ss:$16 sps:$4 sm:$0xff]  }
 0x219   : > { %3186 = vmatprep.subr.bf16.mxu1 %v7124_v4  ;;  %4006 = vmatpush1.bf16.msra.mxu0 %v7125_v5  ;;  %v7202_v4 = vld [vmem:[%s9508_s2 + $0x464] ss:$16 sps:$4 sm:$0xff]   ;;  %v4214_v5 = vld [vmem:[#allocation2 + $0x58] sm:$0x3] }
 0x21a   : > { %4007 = vmatprep.subr.bf16.mxu0 %v7133_v6  ;;  %v7197_v6 = vld [vmem:[%s9508_s2 + $0x128] ss:$16 sps:$4 sm:$0xff]  }
 0x21c   : > { %3187 = vmatpush1.bf16.msra.mxu1 %v7122_v7  ;;  %v4209_v7 = vld [vmem:[#allocation2 + $0x8] sm:$0xfc] }
 0x21d   : > { %3188 = vmatprep.subr.bf16.mxu1 %v7130_v8  ;;  %4008 = vmatpush1.bf16.msra.mxu0 %v7131_v9  ;;  %v7200_v8 = vld [vmem:[%s9508_s2 + $0x460] ss:$16 sps:$4 sm:$0xff]   ;;  %v7205_v9 = vld [vmem:[%s9508_s2 + $0x14c] ss:$16 sps:$4 sm:$0xff]  }
 0x21e   : > { %4009 = vmatprep.subr.bf16.mxu0 %v7139_v27  ;;  %v4224_v27 = vpack.c.bf16 %v4214_v5, %v4214_v5  ;;  %v7254_v5 = vld [vmem:[%s9508_s2 + $0x268] ss:$16 sps:$4 sm:$0xff]  }
 0x220   : > { %3189 = vmatpush1.bf16.msra.mxu1 %v7128_v10  ;;  %v7211_v10 = vld [vmem:[%s9508_s2 + $0x904] ss:$16 sps:$4 sm:$0xff]  }
 0x221   : > { %3190 = vmatprep.subr.bf16.mxu1 %v7136_v11  ;;  %4010 = vmatpush1.bf16.msra.mxu0 %v7137_v12  ;;  %v7497_v11 = vld [vmem:[#allocation2 + $0x30] sm:$0xff] }
 0x222   : > { %4011 = vmatprep.subr.bf16.mxu0 %v7142_v55  ;;  %v4219_v12 = vpack.c.bf16 %v7497_v11, %v4209_v7  ;;  %v7203_v55 = vld [vmem:[%s9508_s2 + $0x148] ss:$16 sps:$4 sm:$0xff]   ;;  %v7263_v7 = vld [vmem:[%s9508_s2 + $0xa20] ss:$16 sps:$4 sm:$0xff]   ;;  %v7277_v11 = vld [vmem:[%s9508_s2 + $0xa64] ss:$16 sps:$4 sm:$0xff]  }
 0x224   : > { %3191 = vmatpush1.bf16.msra.mxu1 %v7134_v15  ;;  %v1861_v15 = vld [vmem:[#allocation2 + $0x20] sm:$0xff] }
 0x225   : > { %4079 = vmatprep.subr.bf16.mxu1 %v7145_v23  ;;  %4012 = vmatpush1.bf16.msra.mxu0 %v7140_v21  ;;  %v7208_v21 = vld [vmem:[%s9508_s2 + $0x16c] ss:$16 sps:$4 sm:$0xff]   ;;  %v7209_v23 = vld [vmem:[%s9508_s2 + $0x900] ss:$16 sps:$4 sm:$0xff]  }
 0x226   : > { %4013 = vmatprep.subr.bf16.mxu0 %v7148_v19  ;;  %v4388_v19 = vrot.slane %v4224_v27, 1  ;;  %v7268_v27 = vld [vmem:[%s9508_s2 + $0x2ac] ss:$16 sps:$4 sm:$0xff]  }
 0x227   : > { %6050 = vmatmul.mubr.msk.bf16.vlgmr.msra.gmra.mrb[0].mxu1 %vm1849_vm8, %v8278_v22  ;;  %v7160_v22 = vld [vmem:[%s9508_s2 + $0x384] ss:$16 sps:$4 sm:$0xff]  }
 0x228   : > { %4080 = vmatpush1.bf16.msra.mxu1 %v7143_v24  ;;  %4111 = vmatprep.mubr.bf16.mxu1 %v8411_v13  ;;  %v7155_v13 = vld [vmem:[%s9508_s2 + $0x48] ss:$16 sps:$4 sm:$0xff]   ;;  %v8861_v24 = vpack.c.bf16 %v8252_v58, %v1861_v15  ;;  %v7214_v58 = vld [vmem:[%s9508_s2 + $0x18c] ss:$16 sps:$4 sm:$0xff]   ;;  %v7275_v15 = vld [vmem:[%s9508_s2 + $0xa60] ss:$16 sps:$4 sm:$0xff]  }
 0x229   : > { %4081 = vmatprep.subr.bf16.mxu1 %v7151_v26  ;;  %4014 = vmatpush1.bf16.msra.mxu0 %v7146_v25  ;;  %v7217_v25 = vld [vmem:[%s9508_s2 + $0x924] ss:$16 sps:$4 sm:$0xff]   ;;  %v4387_v26 = vrot.slane %v4219_v12, 1  ;;  %v7266_v12 = vld [vmem:[%s9508_s2 + $0x2a8] ss:$16 sps:$4 sm:$0xff]  }
 0x22a   : > { %4015 = vmatprep.subr.bf16.mxu0 %v7154_v28  ;;  %v7206_v28 = vld [vmem:[%s9508_s2 + $0x168] ss:$16 sps:$4 sm:$0xff]  }
 0x22c   : > { %4082 = vmatpush1.bf16.msra.mxu1 %v7149_v33  ;;  %v8872_v33 = vsel %vm4383_vm9, %v4387_v26, %v4388_v19  ;;  %v7280_v19 = vld [vmem:[%s9508_s2 + $0x2ec] ss:$16 sps:$4 sm:$0xff]   ;;  %v7289_v26 = vld [vmem:[%s9508_s2 + $0xaa4] ss:$16 sps:$4 sm:$0xff]  }
 0x22d   : > { %4083 = vmatprep.subr.bf16.mxu1 %v7157_v30  ;;  %4016 = vmatpush1.bf16.msra.mxu0 %v7152_v29  ;;  %v7215_v29 = vld [vmem:[%s9508_s2 + $0x920] ss:$16 sps:$4 sm:$0xff]   ;;  %v7223_v30 = vld [vmem:[%s9508_s2 + $0x944] ss:$16 sps:$4 sm:$0xff]  }
 0x22e   : > { %4017 = vmatprep.subr.bf16.mxu0 %v7160_v22  ;;  %v7212_v22 = vld [vmem:[%s9508_s2 + $0x188] ss:$16 sps:$4 sm:$0xff]  }
 0x230   : > { %4084 = vmatpush1.bf16.msra.mxu1 %v7155_v13  ;;  %v7220_v13 = vld [vmem:[%s9508_s2 + $0x1ac] ss:$16 sps:$4 sm:$0xff]  }
 0x231   : > { %4085 = vmatprep.subr.bf16.mxu1 %v7163_v32  ;;  %4018 = vmatpush1.bf16.msra.mxu0 %v7158_v31  ;;  %v7221_v31 = vld [vmem:[%s9508_s2 + $0x940] ss:$16 sps:$4 sm:$0xff]   ;;  %v7229_v32 = vld [vmem:[%s9508_s2 + $0x964] ss:$16 sps:$4 sm:$0xff]  }
 0x232   : > { %4019 = vmatprep.subr.bf16.mxu0 %v7166_v34  ;;  %v7218_v34 = vld [vmem:[%s9508_s2 + $0x1a8] ss:$16 sps:$4 sm:$0xff]  }
 0x234   : > { %4086 = vmatpush1.bf16.msra.mxu1 %v7161_v35  ;;  %v7226_v35 = vld [vmem:[%s9508_s2 + $0x1cc] ss:$16 sps:$4 sm:$0xff]  }
 0x235   : > { %4087 = vmatprep.subr.bf16.mxu1 %v7169_v45  ;;  %4020 = vmatpush1.bf16.msra.mxu0 %v7164_v37  ;;  %v7227_v37 = vld [vmem:[%s9508_s2 + $0x960] ss:$16 sps:$4 sm:$0xff]   ;;  %v7235_v45 = vld [vmem:[%s9508_s2 + $0x984] ss:$16 sps:$4 sm:$0xff]  }
 0x236   : > { %4021 = vmatprep.subr.bf16.mxu0 %v7172_v46  ;;  %v7224_v46 = vld [vmem:[%s9508_s2 + $0x1c8] ss:$16 sps:$4 sm:$0xff]  }
 0x238   : > { %4088 = vmatpush1.bf16.msra.mxu1 %v7167_v17  ;;  %v7232_v17 = vld [vmem:[%s9508_s2 + $0x1ec] ss:$16 sps:$4 sm:$0xff]  }
 0x239   : > { %4089 = vmatprep.subr.bf16.mxu1 %v7175_v49  ;;  %4022 = vmatpush1.bf16.msra.mxu0 %v7170_v48  ;;  %v7233_v48 = vld [vmem:[%s9508_s2 + $0x980] ss:$16 sps:$4 sm:$0xff]   ;;  %v7241_v49 = vld [vmem:[%s9508_s2 + $0x9a4] ss:$16 sps:$4 sm:$0xff]  }
 0x23a   : > { %4023 = vmatprep.subr.bf16.mxu0 %v7178_v20  ;;  %v7230_v20 = vld [vmem:[%s9508_s2 + $0x1e8] ss:$16 sps:$4 sm:$0xff]  }
 0x23c   : > { %4090 = vmatpush1.bf16.msra.mxu1 %v7173_v50  ;;  %v7238_v50 = vld [vmem:[%s9508_s2 + $0x20c] ss:$16 sps:$4 sm:$0xff]  }
 0x23d   : > { %4091 = vmatprep.subr.bf16.mxu1 %v7181_v52  ;;  %4024 = vmatpush1.bf16.msra.mxu0 %v7176_v51  ;;  %v7239_v51 = vld [vmem:[%s9508_s2 + $0x9a0] ss:$16 sps:$4 sm:$0xff]   ;;  %v7247_v52 = vld [vmem:[%s9508_s2 + $0x9c4] ss:$16 sps:$4 sm:$0xff]  }
 0x23e   : > { %4036 = vmatprep.subr.bf16.mxu0 %v7184_v53  ;;  %v7236_v53 = vld [vmem:[%s9508_s2 + $0x208] ss:$16 sps:$4 sm:$0xff]  }
 0x240   : > { %4092 = vmatpush1.bf16.msra.mxu1 %v7179_v16  ;;  %4026 = vmatmul.mubr.bf16.vlgmr.msra.gmra.mrb[16].mxu0 %v8808_v59  ;;  %v7245_v16 = vld [vmem:[%s9508_s2 + $0x9c0] ss:$16 sps:$4 sm:$0xff]  }
 0x241   : > { %4093 = vmatprep.subr.bf16.mxu1 %v7187_v57  ;;  %4037 = vmatpush1.bf16.msra.mxu0 %v7182_v56  ;;  %v7253_v56 = vld [vmem:[%s9508_s2 + $0x9e4] ss:$16 sps:$4 sm:$0xff]   ;;  %v7242_v57 = vld [vmem:[%s9508_s2 + $0x228] ss:$16 sps:$4 sm:$0xff]  }
 0x242   : > { %4038 = vmatprep.subr.bf16.mxu0 %v7190_v60  ;;  %4068 = vmatprep.mubr.bf16.mxu0 %v7507_v2  ;;  %v7250_v60 = vld [vmem:[%s9508_s2 + $0x24c] ss:$16 sps:$4 sm:$0xff]  }
 0x244   : > { %4094 = vmatpush1.bf16.msra.mxu1 %v7185_v61  ;;  %v7251_v61 = vld [vmem:[%s9508_s2 + $0x9e0] ss:$16 sps:$4 sm:$0xff]  }
 0x245   : > { %4095 = vmatprep.subr.bf16.mxu1 %v7193_v18  ;;  %4039 = vmatpush1.bf16.msra.mxu0 %v7188_v62 }
 0x246   : > { %4040 = vmatprep.subr.bf16.mxu0 %v7196_v63  ;;  %v7248_v63 = vld [vmem:[%s9508_s2 + $0x248] ss:$16 sps:$4 sm:$0xff]  }
 0x248   : > { %4096 = vmatpush1.bf16.msra.mxu1 %v7191_v0 }
 0x249   : > { %4097 = vmatprep.subr.bf16.mxu1 %v7199_v3  ;;  %4041 = vmatpush1.bf16.msra.mxu0 %v7194_v1  ;;  %v7256_v1 = vld [vmem:[%s9508_s2 + $0x26c] ss:$16 sps:$4 sm:$0xff]   ;;  %v7257_v3 = vld [vmem:[%s9508_s2 + $0xa00] ss:$16 sps:$4 sm:$0xff]  }
 0x24a   : > { %4042 = vmatprep.subr.bf16.mxu0 %v7202_v4  ;;  %v7265_v4 = vld [vmem:[%s9508_s2 + $0xa24] ss:$16 sps:$4 sm:$0xff]  }
 0x24c   : > { %4098 = vmatpush1.bf16.msra.mxu1 %v7197_v6  ;;  %v7262_v6 = vld [vmem:[%s9508_s2 + $0x28c] ss:$16 sps:$4 sm:$0xff]  }
 0x24d   : > { %4099 = vmatprep.subr.bf16.mxu1 %v7205_v9  ;;  %4043 = vmatpush1.bf16.msra.mxu0 %v7200_v8  ;;  %v7271_v8 = vld [vmem:[%s9508_s2 + $0xa44] ss:$16 sps:$4 sm:$0xff]   ;;  %v7260_v9 = vld [vmem:[%s9508_s2 + $0x288] ss:$16 sps:$4 sm:$0xff]  }
 0x24e   : > { %5126 = vmatprep.subr.bf16.mxu0 %v7211_v10  ;;  %v7269_v10 = vld [vmem:[%s9508_s2 + $0xa40] ss:$16 sps:$4 sm:$0xff]  }
 0x250   : > { %4100 = vmatpush1.bf16.msra.mxu1 %v7203_v55  ;;  %6195 = vmatmul.mubr.msk.bf16.vlgmr.msra.gmra.mrb[16].mxu0 %vm1849_vm8, %v8861_v24  ;;  %v7274_v55 = vld [vmem:[%s9508_s2 + $0x2cc] ss:$16 sps:$4 sm:$0xff]  }
 0x251   : > { %4101 = vmatprep.subr.bf16.mxu1 %v7208_v21  ;;  %5127 = vmatpush1.bf16.msra.mxu0 %v7209_v23  ;;  %v7283_v21 = vld [vmem:[%s9508_s2 + $0xa84] ss:$16 sps:$4 sm:$0xff]   ;;  %v7272_v23 = vld [vmem:[%s9508_s2 + $0x2c8] ss:$16 sps:$4 sm:$0xff]  }
 0x252   : > { %5158 = vmatprep.mubr.bf16.mxu0 %v8872_v33  ;;  %5128 = vmatprep.subr.bf16.mxu0 %v7217_v25  ;;  %v7281_v25 = vld [vmem:[%s9508_s2 + $0xa80] ss:$16 sps:$4 sm:$0xff]  }
 0x254   : > { %4102 = vmatpush1.bf16.msra.mxu1 %v7206_v28  ;;  %v7278_v28 = vld [vmem:[%s9508_s2 + $0x2e8] ss:$16 sps:$4 sm:$0xff]  }
 0x255   : > { %4103 = vmatprep.subr.bf16.mxu1 %v7214_v58  ;;  %5129 = vmatpush1.bf16.msra.mxu0 %v7215_v29  ;;  %v7286_v58 = vld [vmem:[%s9508_s2 + $0x30c] ss:$16 sps:$4 sm:$0xff]   ;;  %v7287_v29 = vld [vmem:[%s9508_s2 + $0xaa0] ss:$16 sps:$4 sm:$0xff]  }
 0x256   : > { %5130 = vmatprep.subr.bf16.mxu0 %v7223_v30  ;;  %v7295_v30 = vld [vmem:[%s9508_s2 + $0xac4] ss:$16 sps:$4 sm:$0xff]  }
 0x258   : > { %4104 = vmatpush1.bf16.msra.mxu1 %v7212_v22  ;;  %v7284_v22 = vld [vmem:[%s9508_s2 + $0x308] ss:$16 sps:$4 sm:$0xff]  }
 0x259   : > { %4105 = vmatprep.subr.bf16.mxu1 %v7220_v13  ;;  %5131 = vmatpush1.bf16.msra.mxu0 %v7221_v31  ;;  %v4213_v13 = vld [vmem:[#allocation2 + $0x50] sm:$0x3]  ;;  %v7292_v31 = vld [vmem:[%s9508_s2 + $0x32c] ss:$16 sps:$4 sm:$0xff]  }
 0x25a   : > { %5132 = vmatprep.subr.bf16.mxu0 %v7229_v32  ;;  %v7293_v32 = vld [vmem:[%s9508_s2 + $0xac0] ss:$16 sps:$4 sm:$0xff]  }
 0x25c   : > { %4106 = vmatpush1.bf16.msra.mxu1 %v7218_v34  ;;  %v7301_v34 = vld [vmem:[%s9508_s2 + $0xae4] ss:$16 sps:$4 sm:$0xff]  }
 0x25d   : > { %4107 = vmatprep.subr.bf16.mxu1 %v7226_v35  ;;  %5133 = vmatpush1.bf16.msra.mxu0 %v7227_v37  ;;  %v4208_v35 = vld [vmem:[#allocation2] sm:$0xfc]  ;;  %v4223_v37 = vpack.c.bf16 %v4213_v13, %v4213_v13  ;;  %v7346_v13 = vld [vmem:[%s9508_s2 + $0x44c] ss:$16 sps:$4 sm:$0xff]  }
 0x25e   : > { %5134 = vmatprep.subr.bf16.mxu0 %v7235_v45  ;;  %v7290_v45 = vld [vmem:[%s9508_s2 + $0x328] ss:$16 sps:$4 sm:$0xff]  }
 0x260   : > { %4108 = vmatpush1.bf16.msra.mxu1 %v7224_v46  ;;  %v7298_v46 = vld [vmem:[%s9508_s2 + $0x34c] ss:$16 sps:$4 sm:$0xff]  }
 0x261   : > { %4109 = vmatprep.subr.bf16.mxu1 %v7232_v17  ;;  %5135 = vmatpush1.bf16.msra.mxu0 %v7233_v48  ;;  %v7299_v17 = vld [vmem:[%s9508_s2 + $0xae0] ss:$16 sps:$4 sm:$0xff]   ;;  %v7498_v48 = vld [vmem:[#allocation2 + $0x28] sm:$0xff] }
 0x262   : > { %5136 = vmatprep.subr.bf16.mxu0 %v7241_v49  ;;  %v4218_v49 = vpack.c.bf16 %v7498_v48, %v4208_v35  ;;  %v7353_v35 = vld [vmem:[%s9508_s2 + $0xc00] ss:$16 sps:$4 sm:$0xff]   ;;  %v7364_v48 = vld [vmem:[%s9508_s2 + $0xc44] ss:$16 sps:$4 sm:$0xff]  }
 0x264   : > { %4110 = vmatpush1.bf16.msra.mxu1 %v7230_v20  ;;  %v7307_v20 = vld [vmem:[%s9508_s2 + $0xb04] ss:$16 sps:$4 sm:$0xff]  }
 0x265   : > { %4122 = vmatprep.subr.bf16.mxu1 %v7238_v50  ;;  %5137 = vmatpush1.bf16.msra.mxu0 %v7239_v51  ;;  %v4385_v50 = vrot.slane %v4223_v37, 1  ;;  %v7296_v51 = vld [vmem:[%s9508_s2 + $0x348] ss:$16 sps:$4 sm:$0xff]   ;;  %v7358_v37 = vld [vmem:[%s9508_s2 + $0xc24] ss:$16 sps:$4 sm:$0xff]  }
 0x266   : > { %5138 = vmatprep.subr.bf16.mxu0 %v7247_v52  ;;  %v7304_v52 = vld [vmem:[%s9508_s2 + $0x36c] ss:$16 sps:$4 sm:$0xff]  }
 0x267   : > { %4112 = vmatmul.mubr.bf16.vlgmr.msra.gmra.mrb[0].mxu1 %v8603_v44  ;;  %v7259_v44 = vld [vmem:[%s9508_s2 + $0xa04] ss:$16 sps:$4 sm:$0xff]  }
 0x268   : > { %4123 = vmatpush1.bf16.msra.mxu1 %v7236_v53  ;;  %4154 = vmatprep.mubr.bf16.mxu1 %v8613_v47  ;;  %v4384_v53 = vrot.slane %v4218_v49, 1  ;;  %v7359_v49 = vld [vmem:[%s9508_s2 + $0x908] ss:$16 sps:$4 sm:$0xff]  }
 0x269   : > { %4124 = vmatprep.subr.bf16.mxu1 %v7244_v36  ;;  %5139 = vmatpush1.bf16.msra.mxu0 %v7245_v16  ;;  %v7305_v36 = vld [vmem:[%s9508_s2 + $0xb00] ss:$16 sps:$4 sm:$0xff]   ;;  %v7313_v16 = vld [vmem:[%s9508_s2 + $0xb24] ss:$16 sps:$4 sm:$0xff]  }
 0x26a   : > { %v8955_v62 = vpop.f32.mrb[12].mxu1  ;;  %5140 = vmatprep.subr.bf16.mxu0 %v7253_v56  ;;  %v9075_v56 = vsel %vm4383_vm9, %v4384_v53, %v4385_v50  ;;  %v7367_v50 = vld [vmem:[%s9508_s2 + $0x92c] ss:$16 sps:$4 sm:$0xff]   ;;  %v7368_v53 = vld [vmem:[%s9508_s2 + $0xc60] ss:$16 sps:$4 sm:$0xff]  }
 0x26b   : > { %v8960_v47 = vpop.f32.mrb[13].mxu1 }
 0x26c   : > { %4125 = vmatpush1.bf16.msra.mxu1 %v7242_v57  ;;  %v8962_v18 = vpop.f32.mrb[14].mxu1  ;;  %v7302_v57 = vld [vmem:[%s9508_s2 + $0x368] ss:$16 sps:$4 sm:$0xff]  }
 0x26d   : > { %v8967_v0 = vpop.f32.mrb[15].mxu1  ;;  %4126 = vmatprep.subr.bf16.mxu1 %v7250_v60  ;;  %5141 = vmatpush1.bf16.msra.mxu0 %v7251_v61  ;;  %v7310_v60 = vld [vmem:[%s9508_s2 + $0x38c] ss:$16 sps:$4 sm:$0xff]   ;;  %v7311_v61 = vld [vmem:[%s9508_s2 + $0xb20] ss:$16 sps:$4 sm:$0xff]  }
 0x26e   : > { %5142 = vmatprep.subr.bf16.mxu0 %v7259_v44  ;;  %v7319_v44 = vld [vmem:[%s9508_s2 + $0xb44] ss:$16 sps:$4 sm:$0xff]  }
 0x270   : > { %4127 = vmatpush1.bf16.msra.mxu1 %v7248_v63 }
 0x271   : > { %4128 = vmatprep.subr.bf16.mxu1 %v7256_v1  ;;  %5143 = vmatpush1.bf16.msra.mxu0 %v7257_v3 }
 0x272   : > { %5144 = vmatprep.subr.bf16.mxu0 %v7265_v4  ;;  %v7308_v4 = vld [vmem:[%s9508_s2 + $0x388] ss:$16 sps:$4 sm:$0xff]  }
 0x274   : > { %4129 = vmatpush1.bf16.msra.mxu1 %v7254_v5 }
 0x275   : > { %4130 = vmatprep.subr.bf16.mxu1 %v7262_v6  ;;  %5145 = vmatpush1.bf16.msra.mxu0 %v7263_v7  ;;  %v7316_v7 = vld [vmem:[%s9508_s2 + $0x3ac] ss:$16 sps:$4 sm:$0xff]  }
 0x276   : > { %5146 = vmatprep.subr.bf16.mxu0 %v7271_v8 }
 0x278   : > { %4131 = vmatpush1.bf16.msra.mxu1 %v7260_v9 }
 0x279   : > { %4132 = vmatprep.subr.bf16.mxu1 %v7268_v27  ;;  %5147 = vmatpush1.bf16.msra.mxu0 %v7269_v10  ;;  %v7314_v10 = vld [vmem:[%s9508_s2 + $0x3a8] ss:$16 sps:$4 sm:$0xff]  }
 0x27a   : > { %5148 = vmatprep.subr.bf16.mxu0 %v7277_v11  ;;  %v7323_v11 = vld [vmem:[%s9508_s2 + $0xb60] ss:$16 sps:$4 sm:$0xff]  }
 0x27c   : > { %4133 = vmatpush1.bf16.msra.mxu1 %v7266_v12  ;;  %v7320_v12 = vld [vmem:[%s9508_s2 + $0x3c8] ss:$16 sps:$4 sm:$0xff]  }
 0x27d   : > { %4134 = vmatprep.subr.bf16.mxu1 %v7274_v55  ;;  %5149 = vmatpush1.bf16.msra.mxu0 %v7275_v15  ;;  %v7328_v55 = vld [vmem:[%s9508_s2 + $0x3ec] ss:$16 sps:$4 sm:$0xff]   ;;  %v7329_v15 = vld [vmem:[%s9508_s2 + $0xb80] ss:$16 sps:$4 sm:$0xff]  }
 0x27e   : > { %5150 = vmatprep.subr.bf16.mxu0 %v7283_v21  ;;  %v7337_v21 = vld [vmem:[%s9508_s2 + $0xba4] ss:$16 sps:$4 sm:$0xff]  }
 0x280   : > { %4135 = vmatpush1.bf16.msra.mxu1 %v7272_v23  ;;  %v7326_v23 = vld [vmem:[%s9508_s2 + $0x3e8] ss:$16 sps:$4 sm:$0xff]  }
 0x281   : > { %4136 = vmatprep.subr.bf16.mxu1 %v7280_v19  ;;  %5151 = vmatpush1.bf16.msra.mxu0 %v7281_v25  ;;  %v7334_v19 = vld [vmem:[%s9508_s2 + $0x40c] ss:$16 sps:$4 sm:$0xff]   ;;  %v7335_v25 = vld [vmem:[%s9508_s2 + $0xba0] ss:$16 sps:$4 sm:$0xff]  }
 0x282   : > { %5152 = vmatprep.subr.bf16.mxu0 %v7289_v26  ;;  %v7343_v26 = vld [vmem:[%s9508_s2 + $0xbc4] ss:$16 sps:$4 sm:$0xff]  }
 0x284   : > { %4137 = vmatpush1.bf16.msra.mxu1 %v7278_v28  ;;  %v7332_v28 = vld [vmem:[%s9508_s2 + $0x408] ss:$16 sps:$4 sm:$0xff]  }
 0x285   : > { %4138 = vmatprep.subr.bf16.mxu1 %v7286_v58  ;;  %5153 = vmatpush1.bf16.msra.mxu0 %v7287_v29  ;;  %v7340_v58 = vld [vmem:[%s9508_s2 + $0x42c] ss:$16 sps:$4 sm:$0xff]   ;;  %v7341_v29 = vld [vmem:[%s9508_s2 + $0xbc0] ss:$16 sps:$4 sm:$0xff]  }
 0x286   : > { %5154 = vmatprep.subr.bf16.mxu0 %v7295_v30  ;;  %v7349_v30 = vld [vmem:[%s9508_s2 + $0xbe4] ss:$16 sps:$4 sm:$0xff]  }
 0x288   : > { %4139 = vmatpush1.bf16.msra.mxu1 %v7284_v22  ;;  %v7338_v22 = vld [vmem:[%s9508_s2 + $0x428] ss:$16 sps:$4 sm:$0xff]  }
 0x289   : > { %4140 = vmatprep.subr.bf16.mxu1 %v7292_v31  ;;  %5155 = vmatpush1.bf16.msra.mxu0 %v7293_v32  ;;  %v7347_v31 = vld [vmem:[%s9508_s2 + $0xbe0] ss:$16 sps:$4 sm:$0xff]   ;;  %v7344_v32 = vld [vmem:[%s9508_s2 + $0x448] ss:$16 sps:$4 sm:$0xff]  }
 0x28a   : > { %5156 = vmatprep.subr.bf16.mxu0 %v7301_v34  ;;  %v7352_v34 = vld [vmem:[%s9508_s2 + $0x46c] ss:$16 sps:$4 sm:$0xff]  }
 0x28c   : > { %4141 = vmatpush1.bf16.msra.mxu1 %v7290_v45  ;;  %v7350_v45 = vld [vmem:[%s9508_s2 + $0x468] ss:$16 sps:$4 sm:$0xff]  }
 0x28d   : > { %4142 = vmatprep.subr.bf16.mxu1 %v7298_v46  ;;  %5157 = vmatpush1.bf16.msra.mxu0 %v7299_v17  ;;  %v7356_v46 = vld [vmem:[%s9508_s2 + $0xc20] ss:$16 sps:$4 sm:$0xff]   ;;  %v7361_v17 = vld [vmem:[%s9508_s2 + $0x90c] ss:$16 sps:$4 sm:$0xff]  }
 0x28e   : > { %5169 = vmatprep.subr.bf16.mxu0 %v7307_v20  ;;  %v7362_v20 = vld [vmem:[%s9508_s2 + $0xc40] ss:$16 sps:$4 sm:$0xff]  }
 0x290   : > { %4143 = vmatpush1.bf16.msra.mxu1 %v7296_v51  ;;  %5159 = vmatmul.mubr.bf16.vlgmr.msra.gmra.mrb[16].mxu0 %v9075_v56  ;;  %v7370_v51 = vld [vmem:[%s9508_s2 + $0xc64] ss:$16 sps:$4 sm:$0xff]  }
 0x291   : > { %4144 = vmatprep.subr.bf16.mxu1 %v7304_v52  ;;  %5170 = vmatpush1.bf16.msra.mxu0 %v7305_v36  ;;  %v7365_v52 = vld [vmem:[%s9508_s2 + $0x928] ss:$16 sps:$4 sm:$0xff]   ;;  %v7373_v36 = vld [vmem:[%s9508_s2 + $0x94c] ss:$16 sps:$4 sm:$0xff]  }
 0x292   : > { %5201 = vmatprep.mubr.bf16.mxu0 %v8241_v41  ;;  %5171 = vmatprep.subr.bf16.mxu0 %v7313_v16  ;;  %v7374_v16 = vld [vmem:[%s9508_s2 + $0xc80] ss:$16 sps:$4 sm:$0xff]  }
 0x293   : > { %v3046_v63 = vpop.f32.mrb[0].mxu0 }
 0x294   : > { %4145 = vmatpush1.bf16.msra.mxu1 %v7302_v57  ;;  %v9092_v1 = vadd.f32 %v8955_v62, %v3046_v63  ;;  %v3048_v3 = vpop.f32.mrb[1].mxu0  ;;  %v7317_v62 = vld [vmem:[%s9508_s2 + $0xb40] ss:$16 sps:$4 sm:$0xff]   ;;  %v7379_v57 = vld [vmem:[%s9508_s2 + $0x96c] ss:$16 sps:$4 sm:$0xff]  }
 0x295   : > { %v9098_v5 = vadd.f32 %v8960_v47, %v3048_v3  ;;  %4146 = vmatprep.subr.bf16.mxu1 %v7310_v60  ;;  %v3050_v6 = vpop.f32.mrb[2].mxu0  ;;  %5172 = vmatpush1.bf16.msra.mxu0 %v7311_v61  ;;  %v7325_v47 = vld [vmem:[%s9508_s2 + $0xb64] ss:$16 sps:$4 sm:$0xff]   ;;  %v7377_v61 = vld [vmem:[%s9508_s2 + $0x968] ss:$16 sps:$4 sm:$0xff]  }
 0x296   : > { %v9107_v8 = vadd.f32 %v8962_v18, %v3050_v6  ;;  %v3052_v9 = vpop.f32.mrb[3].mxu0  ;;  %5173 = vmatprep.subr.bf16.mxu0 %v7319_v44  ;;  %v7322_v18 = vld [vmem:[%s9508_s2 + $0x3cc] ss:$16 sps:$4 sm:$0xff]   ;;  %v7382_v60 = vld [vmem:[%s9508_s2 + $0xca4] ss:$16 sps:$4 sm:$0xff]  }
 0x297   : > { %v9113_v27 = vadd.f32 %v8967_v0, %v3052_v9  ;;  %v7331_v0 = vld [vmem:[%s9508_s2 + $0xb84] ss:$16 sps:$4 sm:$0xff]   ;;  %v7380_v44 = vld [vmem:[%s9508_s2 + $0xca0] ss:$16 sps:$4 sm:$0xff]   ;;  %v7385_v63 = vld [vmem:[%s9508_s2 + $0x98c] ss:$16 sps:$4 sm:$0xff]  }
 0x298   : > { %4147 = vmatpush1.bf16.msra.mxu1 %v7308_v4  ;;  %v7388_v3 = vld [vmem:[%s9508_s2 + $0xcc4] ss:$16 sps:$4 sm:$0xff]   ;;  %v7383_v4 = vld [vmem:[%s9508_s2 + $0x988] ss:$16 sps:$4 sm:$0xff]   ;;  %v7386_v6 = vld [vmem:[%s9508_s2 + $0xcc0] ss:$16 sps:$4 sm:$0xff]  }
 0x299   : > { %4148 = vmatprep.subr.bf16.mxu1 %v7316_v7  ;;  %5174 = vmatpush1.bf16.msra.mxu0 %v7317_v62  ;;  %v7391_v7 = vld [vmem:[%s9508_s2 + $0x9ac] ss:$16 sps:$4 sm:$0xff]   ;;  %v7394_v62 = vld [vmem:[%s9508_s2 + $0xce4] ss:$16 sps:$4 sm:$0xff]   ;;  %v7389_v9 = vld [vmem:[%s9508_s2 + $0x9a8] ss:$16 sps:$4 sm:$0xff]  }
 0x29a   : > { %5175 = vmatprep.subr.bf16.mxu0 %v7325_v47  ;;  %v7392_v47 = vld [vmem:[%s9508_s2 + $0xce0] ss:$16 sps:$4 sm:$0xff]  }
 0x29c   : > { %4149 = vmatpush1.bf16.msra.mxu1 %v7314_v10  ;;  %v7397_v10 = vld [vmem:[%s9508_s2 + $0x9cc] ss:$16 sps:$4 sm:$0xff]  }
 0x29d   : > { %4150 = vmatprep.subr.bf16.mxu1 %v7322_v18  ;;  %5176 = vmatpush1.bf16.msra.mxu0 %v7323_v11  ;;  %v7400_v18 = vld [vmem:[%s9508_s2 + $0xd04] ss:$16 sps:$4 sm:$0xff]   ;;  %v7395_v11 = vld [vmem:[%s9508_s2 + $0x9c8] ss:$16 sps:$4 sm:$0xff]  }
 0x29e   : > { %5177 = vmatprep.subr.bf16.mxu0 %v7331_v0  ;;  %v7398_v0 = vld [vmem:[%s9508_s2 + $0xd00] ss:$16 sps:$4 sm:$0xff]  }
 0x2a0   : > { %4151 = vmatpush1.bf16.msra.mxu1 %v7320_v12  ;;  %v7403_v12 = vld [vmem:[%s9508_s2 + $0x9ec] ss:$16 sps:$4 sm:$0xff]  }
 0x2a1   : > { %4152 = vmatprep.subr.bf16.mxu1 %v7328_v55  ;;  %5178 = vmatpush1.bf16.msra.mxu0 %v7329_v15  ;;  %v7406_v55 = vld [vmem:[%s9508_s2 + $0xd24] ss:$16 sps:$4 sm:$0xff]   ;;  %v7401_v15 = vld [vmem:[%s9508_s2 + $0x9e8] ss:$16 sps:$4 sm:$0xff]  }
 0x2a2   : > { %5179 = vmatprep.subr.bf16.mxu0 %v7337_v21  ;;  %v7404_v21 = vld [vmem:[%s9508_s2 + $0xd20] ss:$16 sps:$4 sm:$0xff]  }
 0x2a4   : > { %4153 = vmatpush1.bf16.msra.mxu1 %v7326_v23  ;;  %v7409_v23 = vld [vmem:[%s9508_s2 + $0xa0c] ss:$16 sps:$4 sm:$0xff]  }
 0x2a5   : > { %4165 = vmatprep.subr.bf16.mxu1 %v7334_v19  ;;  %5180 = vmatpush1.bf16.msra.mxu0 %v7335_v25  ;;  %v7412_v19 = vld [vmem:[%s9508_s2 + $0xd44] ss:$16 sps:$4 sm:$0xff]   ;;  %v7407_v25 = vld [vmem:[%s9508_s2 + $0xa08] ss:$16 sps:$4 sm:$0xff]  }
 0x2a6   : > { %5181 = vmatprep.subr.bf16.mxu0 %v7343_v26  ;;  %v7410_v26 = vld [vmem:[%s9508_s2 + $0xd40] ss:$16 sps:$4 sm:$0xff]  }
 0x2a7   : > { %4155 = vmatmul.mubr.bf16.vlgmr.msra.gmra.mrb[0].mxu1 %v8808_v59  ;;  %v7355_v59 = vld [vmem:[%s9508_s2 + $0xc04] ss:$16 sps:$4 sm:$0xff]  }
 0x2a8   : > { %4166 = vmatpush1.bf16.msra.mxu1 %v7332_v28  ;;  %4197 = vmatprep.mubr.bf16.mxu1 %v7507_v2  ;;  %v7415_v28 = vld [vmem:[%s9508_s2 + $0xa2c] ss:$16 sps:$4 sm:$0xff]  }
 0x2a9   : > { %4167 = vmatprep.subr.bf16.mxu1 %v7340_v58  ;;  %5182 = vmatpush1.bf16.msra.mxu0 %v7341_v29  ;;  %v7418_v58 = vld [vmem:[%s9508_s2 + $0xd64] ss:$16 sps:$4 sm:$0xff]   ;;  %v7413_v29 = vld [vmem:[%s9508_s2 + $0xa28] ss:$16 sps:$4 sm:$0xff]  }
 0x2aa   : > { %5183 = vmatprep.subr.bf16.mxu0 %v7349_v30  ;;  %v7416_v30 = vld [vmem:[%s9508_s2 + $0xd60] ss:$16 sps:$4 sm:$0xff]  }
 0x2ac   : > { %4168 = vmatpush1.bf16.msra.mxu1 %v7338_v22  ;;  %v7421_v22 = vld [vmem:[%s9508_s2 + $0xa4c] ss:$16 sps:$4 sm:$0xff]  }
 0x2ad   : > { %4169 = vmatprep.subr.bf16.mxu1 %v7346_v13  ;;  %5184 = vmatpush1.bf16.msra.mxu0 %v7347_v31  ;;  %v7419_v13 = vld [vmem:[%s9508_s2 + $0xa48] ss:$16 sps:$4 sm:$0xff]   ;;  %v7424_v31 = vld [vmem:[%s9508_s2 + $0xa6c] ss:$16 sps:$4 sm:$0xff]  }
 0x2ae   : > { %5185 = vmatprep.subr.bf16.mxu0 %v7355_v59  ;;  %v7422_v59 = vld [vmem:[%s9508_s2 + $0xa68] ss:$16 sps:$4 sm:$0xff]  }
 0x2b0   : > { %4170 = vmatpush1.bf16.msra.mxu1 %v7344_v32  ;;  %v7427_v32 = vld [vmem:[%s9508_s2 + $0xa8c] ss:$16 sps:$4 sm:$0xff]  }
 0x2b1   : > { %4171 = vmatprep.subr.bf16.mxu1 %v7352_v34  ;;  %5186 = vmatpush1.bf16.msra.mxu0 %v7353_v35  ;;  %v7425_v34 = vld [vmem:[%s9508_s2 + $0xa88] ss:$16 sps:$4 sm:$0xff]   ;;  %v7430_v35 = vld [vmem:[%s9508_s2 + $0xaac] ss:$16 sps:$4 sm:$0xff]  }
 0x2b2   : > { %5187 = vmatprep.subr.bf16.mxu0 %v7358_v37  ;;  %v7428_v37 = vld [vmem:[%s9508_s2 + $0xaa8] ss:$16 sps:$4 sm:$0xff]  }
 0x2b4   : > { %4172 = vmatpush1.bf16.msra.mxu1 %v7350_v45  ;;  %v7433_v45 = vld [vmem:[%s9508_s2 + $0xacc] ss:$16 sps:$4 sm:$0xff]  }
 0x2b5   : > { %5255 = vmatprep.subr.bf16.mxu1 %v7361_v17  ;;  %5188 = vmatpush1.bf16.msra.mxu0 %v7356_v46  ;;  %v7431_v46 = vld [vmem:[%s9508_s2 + $0xac8] ss:$16 sps:$4 sm:$0xff]   ;;  %v7436_v17 = vld [vmem:[%s9508_s2 + $0xaec] ss:$16 sps:$4 sm:$0xff]  }
 0x2b6   : > { %5189 = vmatprep.subr.bf16.mxu0 %v7364_v48  ;;  %v7434_v48 = vld [vmem:[%s9508_s2 + $0xae8] ss:$16 sps:$4 sm:$0xff]  }
 0x2b7   : > { %6196 = vmatmul.mubr.msk.bf16.vlgmr.msra.gmra.mrb[0].mxu1 %vm1849_vm8, %v8861_v24  ;;  %v7376_v24 = vld [vmem:[%s9508_s2 + $0xc84] ss:$16 sps:$4 sm:$0xff]  }
 0x2b8   : > { %5256 = vmatpush1.bf16.msra.mxu1 %v7359_v49  ;;  %5287 = vmatprep.mubr.bf16.mxu1 %v8872_v33  ;;  %v7371_v33 = vld [vmem:[%s9508_s2 + $0x948] ss:$16 sps:$4 sm:$0xff]   ;;  %v7439_v49 = vld [vmem:[%s9508_s2 + $0xb0c] ss:$16 sps:$4 sm:$0xff]  }
 0x2b9   : > { %5257 = vmatprep.subr.bf16.mxu1 %v7367_v50  ;;  %5190 = vmatpush1.bf16.msra.mxu0 %v7362_v20  ;;  %v7437_v20 = vld [vmem:[%s9508_s2 + $0xb08] ss:$16 sps:$4 sm:$0xff]   ;;  %v7442_v50 = vld [vmem:[%s9508_s2 + $0xb2c] ss:$16 sps:$4 sm:$0xff]  }
 0x2ba   : > { %5191 = vmatprep.subr.bf16.mxu0 %v7370_v51  ;;  %v7440_v51 = vld [vmem:[%s9508_s2 + $0xb28] ss:$16 sps:$4 sm:$0xff]  }
 0x2bc   : > { %5258 = vmatpush1.bf16.msra.mxu1 %v7365_v52  ;;  %v7445_v52 = vld [vmem:[%s9508_s2 + $0xb4c] ss:$16 sps:$4 sm:$0xff]  }
 0x2bd   : > { %5259 = vmatprep.subr.bf16.mxu1 %v7373_v36  ;;  %5192 = vmatpush1.bf16.msra.mxu0 %v7368_v53  ;;  %v7443_v53 = vld [vmem:[%s9508_s2 + $0xb48] ss:$16 sps:$4 sm:$0xff]   ;;  %v7451_v36 = vld [vmem:[%s9508_s2 + $0xb8c] ss:$16 sps:$4 sm:$0xff]  }
 0x2be   : > { %5193 = vmatprep.subr.bf16.mxu0 %v7376_v24  ;;  %v7449_v24 = vld [vmem:[%s9508_s2 + $0xb88] ss:$16 sps:$4 sm:$0xff]  }
 0x2c0   : > { %5260 = vmatpush1.bf16.msra.mxu1 %v7371_v33  ;;  %v7454_v33 = vld [vmem:[%s9508_s2 + $0xbac] ss:$16 sps:$4 sm:$0xff]  }
 0x2c1   : > { %5261 = vmatprep.subr.bf16.mxu1 %v7379_v57  ;;  %5194 = vmatpush1.bf16.msra.mxu0 %v7374_v16  ;;  %v7452_v16 = vld [vmem:[%s9508_s2 + $0xba8] ss:$16 sps:$4 sm:$0xff]   ;;  %v7457_v57 = vld [vmem:[%s9508_s2 + $0xbcc] ss:$16 sps:$4 sm:$0xff]  }
 0x2c2   : > { %5195 = vmatprep.subr.bf16.mxu0 %v7382_v60  ;;  %v7455_v60 = vld [vmem:[%s9508_s2 + $0xbc8] ss:$16 sps:$4 sm:$0xff]  }
 0x2c4   : > { %5262 = vmatpush1.bf16.msra.mxu1 %v7377_v61  ;;  %v7460_v61 = vld [vmem:[%s9508_s2 + $0xbec] ss:$16 sps:$4 sm:$0xff]  }
 0x2c5   : > { %5263 = vmatprep.subr.bf16.mxu1 %v7385_v63  ;;  %5196 = vmatpush1.bf16.msra.mxu0 %v7380_v44  ;;  %v7458_v44 = vld [vmem:[%s9508_s2 + $0xbe8] ss:$16 sps:$4 sm:$0xff]   ;;  %v7463_v63 = vld [vmem:[%s9508_s2 + $0xc0c] ss:$16 sps:$4 sm:$0xff]  }
 0x2c6   : > { %5197 = vmatprep.subr.bf16.mxu0 %v7388_v3  ;;  %v7461_v3 = vld [vmem:[%s9508_s2 + $0xc08] ss:$16 sps:$4 sm:$0xff]  }
 0x2c8   : > { %5264 = vmatpush1.bf16.msra.mxu1 %v7383_v4  ;;  %v7466_v4 = vld [vmem:[%s9508_s2 + $0xc2c] ss:$16 sps:$4 sm:$0xff]  }
 0x2c9   : > { %5265 = vmatprep.subr.bf16.mxu1 %v7391_v7  ;;  %5198 = vmatpush1.bf16.msra.mxu0 %v7386_v6  ;;  %v7464_v6 = vld [vmem:[%s9508_s2 + $0xc28] ss:$16 sps:$4 sm:$0xff]   ;;  %v7469_v7 = vld [vmem:[%s9508_s2 + $0xc4c] ss:$16 sps:$4 sm:$0xff]  }
 0x2ca   : > { %5199 = vmatprep.subr.bf16.mxu0 %v7394_v62  ;;  %v7467_v62 = vld [vmem:[%s9508_s2 + $0xc48] ss:$16 sps:$4 sm:$0xff]  }
 0x2cc   : > { %5266 = vmatpush1.bf16.msra.mxu1 %v7389_v9  ;;  %v7472_v9 = vld [vmem:[%s9508_s2 + $0xc6c] ss:$16 sps:$4 sm:$0xff]  }
 0x2cd   : > { %5267 = vmatprep.subr.bf16.mxu1 %v7397_v10  ;;  %5200 = vmatpush1.bf16.msra.mxu0 %v7392_v47  ;;  %v7470_v47 = vld [vmem:[%s9508_s2 + $0xc68] ss:$16 sps:$4 sm:$0xff]   ;;  %v7475_v10 = vld [vmem:[%s9508_s2 + $0xc8c] ss:$16 sps:$4 sm:$0xff]  }
 0x2ce   : > { %5212 = vmatprep.subr.bf16.mxu0 %v7400_v18  ;;  %v7473_v18 = vld [vmem:[%s9508_s2 + $0xc88] ss:$16 sps:$4 sm:$0xff]  }
 0x2d0   : > { %5268 = vmatpush1.bf16.msra.mxu1 %v7395_v11  ;;  %5202 = vmatmul.mubr.bf16.vlgmr.msra.gmra.mrb[16].mxu0 %v8247_v54  ;;  %v7478_v11 = vld [vmem:[%s9508_s2 + $0xcac] ss:$16 sps:$4 sm:$0xff]  }
 0x2d1   : > { %5269 = vmatprep.subr.bf16.mxu1 %v7403_v12  ;;  %5213 = vmatpush1.bf16.msra.mxu0 %v7398_v0  ;;  %v7476_v0 = vld [vmem:[%s9508_s2 + $0xca8] ss:$16 sps:$4 sm:$0xff]   ;;  %v7481_v12 = vld [vmem:[%s9508_s2 + $0xccc] ss:$16 sps:$4 sm:$0xff]  }
 0x2d2   : > { %5214 = vmatprep.subr.bf16.mxu0 %v7406_v55  ;;  %5244 = vmatprep.mubr.bf16.mxu0 %v7507_v2  ;;  %v7479_v55 = vld [vmem:[%s9508_s2 + $0xcc8] ss:$16 sps:$4 sm:$0xff]  }
 0x2d4   : > { %5270 = vmatpush1.bf16.msra.mxu1 %v7401_v15  ;;  %v7484_v15 = vld [vmem:[%s9508_s2 + $0xcec] ss:$16 sps:$4 sm:$0xff]  }
 0x2d5   : > { %5271 = vmatprep.subr.bf16.mxu1 %v7409_v23  ;;  %5215 = vmatpush1.bf16.msra.mxu0 %v7404_v21  ;;  %v7482_v21 = vld [vmem:[%s9508_s2 + $0xce8] ss:$16 sps:$4 sm:$0xff]   ;;  %v7487_v23 = vld [vmem:[%s9508_s2 + $0xd0c] ss:$16 sps:$4 sm:$0xff]  }
 0x2d6   : > { %5216 = vmatprep.subr.bf16.mxu0 %v7412_v19  ;;  %v7485_v19 = vld [vmem:[%s9508_s2 + $0xd08] ss:$16 sps:$4 sm:$0xff]  }
 0x2d8   : > { %5272 = vmatpush1.bf16.msra.mxu1 %v7407_v25  ;;  %v7490_v25 = vld [vmem:[%s9508_s2 + $0xd2c] ss:$16 sps:$4 sm:$0xff]  }
 0x2d9   : > { %5273 = vmatprep.subr.bf16.mxu1 %v7415_v28  ;;  %5217 = vmatpush1.bf16.msra.mxu0 %v7410_v26  ;;  %v7488_v26 = vld [vmem:[%s9508_s2 + $0xd28] ss:$16 sps:$4 sm:$0xff]   ;;  %v7493_v28 = vld [vmem:[%s9508_s2 + $0xd4c] ss:$16 sps:$4 sm:$0xff]  }
 0x2da   : > { %5218 = vmatprep.subr.bf16.mxu0 %v7418_v58  ;;  %v7491_v58 = vld [vmem:[%s9508_s2 + $0xd48] ss:$16 sps:$4 sm:$0xff]  }
 0x2dc   : > { %5274 = vmatpush1.bf16.msra.mxu1 %v7413_v29  ;;  %v5400_v29 = vld [vmem:[%s9510_s4] sm:$0xf] }
 0x2dd   : > { %5275 = vmatprep.subr.bf16.mxu1 %v7421_v22  ;;  %5219 = vmatpush1.bf16.msra.mxu0 %v7416_v30  ;;  %v5405_v30 = vrot.slane %v5400_v29, %v1746_v39 }
 0x2e0   : > { %5276 = vmatpush1.bf16.msra.mxu1 %v7419_v13  ;;  %6485 = vmatmul.mubr.msk.bf16.vlgmr.msra.gmra.mrb[16].mxu0 %vm1849_vm8, %v8269_v14  ;;  %v5409_v13 = vrot.slane %v5400_v29, %v1750_v42 }
 0x2e1   : > { %5277 = vmatprep.subr.bf16.mxu1 %v7424_v31 }
 0x2e4   : > { %5278 = vmatpush1.bf16.msra.mxu1 %v7422_v59 }
 0x2e5   : > { %5279 = vmatprep.subr.bf16.mxu1 %v7427_v32 }
 0x2e8   : > { %5280 = vmatpush1.bf16.msra.mxu1 %v7425_v34 }
 0x2e9   : > { %5281 = vmatprep.subr.bf16.mxu1 %v7430_v35 }
 0x2ec   : > { %5282 = vmatpush1.bf16.msra.mxu1 %v7428_v37 }
 0x2ed   : > { %5283 = vmatprep.subr.bf16.mxu1 %v7433_v45 }
 0x2f0   : > { %5284 = vmatpush1.bf16.msra.mxu1 %v7431_v46 }
 0x2f1   : > { %5285 = vmatprep.subr.bf16.mxu1 %v7436_v17 }
 0x2f4   : > { %5286 = vmatpush1.bf16.msra.mxu1 %v7434_v48 }
 0x2f5   : > { %5298 = vmatprep.subr.bf16.mxu1 %v7439_v49  ;;  %v5417_v49 = vrot.slane %v5400_v29, %v1758_v43 }
 0x2f7   : > { %5288 = vmatmul.mubr.bf16.vlgmr.msra.gmra.mrb[0].mxu1 %v9075_v56  ;;  %v7448_v56 = vld [vmem:[%s9508_s2 + $0xb6c] ss:$16 sps:$4 sm:$0xff]  }
 0x2f8   : > { %5299 = vmatpush1.bf16.msra.mxu1 %v7437_v20  ;;  %5330 = vmatprep.mubr.bf16.mxu1 %v8241_v41  ;;  %v7446_v41 = vld [vmem:[%s9508_s2 + $0xb68] ss:$16 sps:$4 sm:$0xff]  }
 0x2f9   : > { %5300 = vmatprep.subr.bf16.mxu1 %v7442_v50 }
 0x2fc   : > { %5301 = vmatpush1.bf16.msra.mxu1 %v7440_v51 }
 0x2fd   : > { %5302 = vmatprep.subr.bf16.mxu1 %v7445_v52 }
 0x300   : > { %5303 = vmatpush1.bf16.msra.mxu1 %v7443_v53 }
 0x301   : > { %5304 = vmatprep.subr.bf16.mxu1 %v7448_v56 }
 0x304   : > { %5305 = vmatpush1.bf16.msra.mxu1 %v7446_v41 }
 0x305   : > { %5306 = vmatprep.subr.bf16.mxu1 %v7451_v36 }
 0x308   : > { %5307 = vmatpush1.bf16.msra.mxu1 %v7449_v24 }
 0x309   : > { %5308 = vmatprep.subr.bf16.mxu1 %v7454_v33 }
 0x30c   : > { %5309 = vmatpush1.bf16.msra.mxu1 %v7452_v16 }
 0x30d   : > { %5310 = vmatprep.subr.bf16.mxu1 %v7457_v57 }
 0x310   : > { %5311 = vmatpush1.bf16.msra.mxu1 %v7455_v60 }
 0x311   : > { %5312 = vmatprep.subr.bf16.mxu1 %v7460_v61 }
 0x314   : > { %5313 = vmatpush1.bf16.msra.mxu1 %v7458_v44 }
 0x315   : > { %5314 = vmatprep.subr.bf16.mxu1 %v7463_v63 }
 0x318   : > { %5315 = vmatpush1.bf16.msra.mxu1 %v7461_v3 }
 0x319   : > { %5316 = vmatprep.subr.bf16.mxu1 %v7466_v4 }
 0x31c   : > { %5317 = vmatpush1.bf16.msra.mxu1 %v7464_v6 }
 0x31d   : > { %5318 = vmatprep.subr.bf16.mxu1 %v7469_v7 }
 0x320   : > { %5319 = vmatpush1.bf16.msra.mxu1 %v7467_v62 }
 0x321   : > { %5320 = vmatprep.subr.bf16.mxu1 %v7472_v9 }
 0x324   : > { %5321 = vmatpush1.bf16.msra.mxu1 %v7470_v47 }
 0x325   : > { %5322 = vmatprep.subr.bf16.mxu1 %v7475_v10 }
 0x328   : > { %5323 = vmatpush1.bf16.msra.mxu1 %v7473_v18 }
 0x329   : > { %5324 = vmatprep.subr.bf16.mxu1 %v7478_v11 }
 0x32c   : > { %5325 = vmatpush1.bf16.msra.mxu1 %v7476_v0 }
 0x32d   : > { %5326 = vmatprep.subr.bf16.mxu1 %v7481_v12 }
 0x330   : > { %5327 = vmatpush1.bf16.msra.mxu1 %v7479_v55 }
 0x331   : > { %5328 = vmatprep.subr.bf16.mxu1 %v7484_v15 }
 0x334   : > { %5329 = vmatpush1.bf16.msra.mxu1 %v7482_v21 }
 0x335   : > { %5341 = vmatprep.subr.bf16.mxu1 %v7487_v23 }
 0x337   : > { %5331 = vmatmul.mubr.bf16.vlgmr.msra.gmra.mrb[0].mxu1 %v8247_v54  ;;  %v7496_v54 = vld [vmem:[%s9508_s2 + $0xd6c] ss:$16 sps:$4 sm:$0xff]  }
 0x338   : > { %5342 = vmatpush1.bf16.msra.mxu1 %v7485_v19  ;;  %5373 = vmatprep.mubr.bf16.mxu1 %v7507_v2  ;;  %v7494_v2 = vld [vmem:[%s9508_s2 + $0xd68] ss:$16 sps:$4 sm:$0xff]  }
 0x339   : > { %5343 = vmatprep.subr.bf16.mxu1 %v7490_v25 }
 0x33c   : > { %5344 = vmatpush1.bf16.msra.mxu1 %v7488_v26 }
 0x33d   : > { %5345 = vmatprep.subr.bf16.mxu1 %v7493_v28 }
 0x340   : > { %5346 = vmatpush1.bf16.msra.mxu1 %v7491_v58 }
 0x341   : > { %5347 = vmatprep.subr.bf16.mxu1 %v7496_v54 }
 0x344   : > { %5348 = vmatpush1.bf16.msra.mxu1 %v7494_v2 }
 0x347   : > { %6486 = vmatmul.mubr.msk.bf16.vlgmr.msra.gmra.mrb[0].mxu1 %vm1849_vm8, %v8269_v14 }
 0x3b3   : > { %v5246_v22 = vpop.f32.mrb[16].mxu0 }
 0x3b4   : > { %v6551_v31 = vadd.f32 %v9092_v1, %v5246_v22  ;;  %v5248_v59 = vpop.f32.mrb[17].mxu0 }
 0x3b5   : > { %v6553_v32 = vadd.f32 %v9098_v5, %v5248_v59  ;;  %v5250_v34 = vpop.f32.mrb[18].mxu0 }
 0x3b6   : > { %v5422_v35 = vadd.f32 %v6551_v31, %v5405_v30  ;;  %v6555_v14 = vadd.f32 %v9107_v8, %v5250_v34  ;;  %v5252_v37 = vpop.f32.mrb[19].mxu0  ;;  %v5413_v8 = vrot.slane %v5400_v29, %v1754_v40 }
 0x3b7   : > { %v5423_v39 = vadd.f32 %v6553_v32, %v5409_v13  ;;  %v6557_v45 = vadd.f32 %v9113_v27, %v5252_v37 }
 0x3b8   : > { %v5430_v46 = vmax.f32 %v5422_v35, 0.0  ;;  %v5426_v42 = vadd.f32 %v6555_v14, %v5405_v30 }
 0x3b9   : > { %v5431_v17 = vmax.f32 %v5423_v39, 0.0  ;;  %v5427_v48 = vadd.f32 %v6557_v45, %v5409_v13 }
 0x3ba   : > { %5438 = vst [vmem:[%s224_s21] sm:$0xff] %v5430_v46  ;;  %v5434_v1 = vmax.f32 %v5426_v42, 0.0 }
 0x3bb   : > { %5439 = vst [vmem:[%s224_s21 + $0x8] sm:$0xff] %v5431_v17  ;;  %v5435_v5 = vmax.f32 %v5427_v48, 0.0 }
 0x3bc   : > { %5442 = vst [vmem:[%s224_s21 + $0x20] sm:$0xff] %v5434_v1 }
 0x3bd   : > { %5443 = vst [vmem:[%s224_s21 + $0x28] sm:$0xff] %v5435_v5 }
 0x41a   : > { %v5375_v20 = vpop.f32.mrb[0].mxu1 }
 0x41b   : > { %v5424_v50 = vadd.f32 %v5413_v8, %v5375_v20  ;;  %v5377_v51 = vpop.f32.mrb[1].mxu1 }
 0x41c   : > { %v5425_v27 = vadd.f32 %v5417_v49, %v5377_v51  ;;  %v5379_v52 = vpop.f32.mrb[2].mxu1 }
 0x41d   : > { %v5432_v53 = vmax.f32 %v5424_v50, 0.0  ;;  %v5428_v56 = vadd.f32 %v5413_v8, %v5379_v52  ;;  %v5381_v41 = vpop.f32.mrb[3].mxu1 }
 0x41e   : > { %v5433_v36 = vmax.f32 %v5425_v27, 0.0  ;;  %v5429_v24 = vadd.f32 %v5417_v49, %v5381_v41 }
 0x41f   : > { %5440 = vst [vmem:[%s224_s21 + $0x10] sm:$0xff] %v5432_v53  ;;  %v5436_v33 = vmax.f32 %v5428_v56, 0.0 }
 0x420   : > { %5441 = vst [vmem:[%s224_s21 + $0x18] sm:$0xff] %v5433_v36  ;;  %v5437_v16 = vmax.f32 %v5429_v24, 0.0 }
 0x421   : > { %5444 = vst [vmem:[%s224_s21 + $0x30] sm:$0xff] %v5436_v33 }
 0x422   : > { %5445 = vst [vmem:[%s224_s21 + $0x38] sm:$0xff] %v5437_v16 }
 0x423 PF: > { %s15_s18 = sadd.s32 1, %s7505_s18  }
 0x424   : > { %p12_p4 = scmp.ge.s32.totalorder %s15_s18, 4  }
 0x426   :  { %14 = sbr.rel (!%p12_p4) target bundleno = 1 (0x1), region = 75 }

</bundles_post_ra>
